<compile_context>
chip_gen: v6e
topology: v6e:2x2x1
jax: 0.10.0
libtpu: 0.0.40
codegen_flags: <defaults>
</compile_context>

<pallas_src>
import functools

import jax
import jax.numpy as jnp
from jax.experimental import pallas as pl
from jax.experimental.pallas import tpu as pltpu


# -----------------------------------------------------------------------------
# Pallas kernel: whole forward pass in VMEM for one grid step.
# -----------------------------------------------------------------------------
def _lstm_ae_kernel(
    x_ref,                      # (T*B, D)   time-major, batch-padded input
    wenc_ref, benc_ref,         # fused encoder input proj: (D, 8H), (1, 8H)
                                #   columns gate-major/direction-minor:
                                #   [i_f,i_b,f_f,f_b,g_f,g_b,o_f,o_b]
    wehh_ref,                   # block-diag encoder recurrent weight (2H, 8H)
    wld_ref, bld_ref,           # latent folded into decoder input proj
    whd_ref,                    # decoder recurrent weight: (H, 4H)
    wout_ref, bout_ref,         # output Linear (lane-padded): (H, Dp), (1, Dp)
    out_ref,                    # (T*B, Dp)
    *, seq_len, batch, hidden,
):
    T, B, H = seq_len, batch, hidden
    H2, H8 = 2 * H, 8 * H
    Dp = wout_ref.shape[1]

    wehh = wehh_ref[...]
    whd = whd_ref[...]
    wout = wout_ref[...]

    # ---- encoder input projections (both directions), one big MXU call.
    #      Biases folded in here once instead of per step.
    gx = (
        jnp.dot(x_ref[...], wenc_ref[...], preferred_element_type=jnp.float32)
        + benc_ref[...]
    )                                                       # (T*B, 8H)

    # 2H-periodic lane mask: True on forward-direction gate columns.
    col = jax.lax.broadcasted_iota(jnp.int32, (B, H8), 1)
    fwd_mask = (col % H2) < H

    def cell(gates, c, hs, first):
        # Full-width sigmoid once (EUP); tanh only on the g slice.
        sig = jax.nn.sigmoid(gates)
        i = sig[:, 0 * hs:1 * hs]
        f = sig[:, 1 * hs:2 * hs]
        o = sig[:, 3 * hs:4 * hs]
        g = jnp.tanh(gates[:, 2 * hs:3 * hs])
        c_new = i * g if first else f * c + i * g
        return o * jnp.tanh(c_new), c_new

    # ---- fused bidirectional encoder recurrence, fully unrolled over T.
    #      State hc = [h_f | h_b], cc = [c_f | c_b], each (B, 2H).
    hc = cc = None
    for t in range(T):
        rf = t * B                  # forward direction reads step t
        rb = (T - 1 - t) * B        # reverse direction reads step T-1-t
        gates_x = jnp.where(fwd_mask, gx[rf:rf + B, :], gx[rb:rb + B, :])
        if t == 0:
            gates = gates_x         # h == 0: skip dot(0, W)
        else:
            gates = gates_x + jnp.dot(
                hc, wehh, preferred_element_type=jnp.float32)
        hc, cc = cell(gates, cc, H2, first=(t == 0))

    # ---- latent Linear + decoder input projection (constant over time),
    #      pre-fused in the wrapper; hc already holds [h_fwd | h_bwd].
    gx_dec = (
        jnp.dot(hc, wld_ref[...], preferred_element_type=jnp.float32)
        + bld_ref[...]
    )                                                       # (B, 4H)

    # ---- decoder LSTM recurrence, unrolled; per-step lane-dense output
    #      projection stored straight to out_ref (hides under MXU latency).
    bout_b = jnp.broadcast_to(bout_ref[...], (B, Dp))       # hoisted broadcast
    h = c = None
    for t in range(T):
        if t == 0:
            gates = gx_dec          # h == 0: skip dot(0, W)
        else:
            gates = gx_dec + jnp.dot(
                h, whd, preferred_element_type=jnp.float32)
        h, c = cell(gates, c, H, first=(t == 0))
        out_ref[pl.ds(t * B, B), :] = (
            jnp.dot(h, wout, preferred_element_type=jnp.float32) + bout_b)


# -----------------------------------------------------------------------------
# Wrapper: parameter plumbing + pallas_call.
# -----------------------------------------------------------------------------
def _full_spec(a):
    nd = a.ndim
    return pl.BlockSpec(a.shape, lambda i, nd=nd: (0,) * nd)


@jax.jit
def lstm_autoencoder_forward(x, params):
    """x: (B, T, D) batch-first, float32. Returns (B, T, D)."""
    B, T, D = x.shape
    H = params["enc_whh_f"].shape[1]

    Bp = ((B + 7) // 8) * 8                       # sublane-pad the batch
    Dp = max(128, ((D + 127) // 128) * 128)       # lane-pad the output width

    f32 = lambda a: jnp.asarray(a, jnp.float32)

    # --- batch padded, time-major, flattened (glue).
    x_tm = jnp.transpose(f32(x), (1, 0, 2))                       # (T, B, D)
    x_tm = jnp.pad(x_tm, ((0, 0), (0, Bp - B), (0, 0)))           # (T, Bp, D)
    x2d = x_tm.reshape(T * Bp, D)                                 # (T*Bp, D)

    def gate_blocks(w):   # (4H, X) -> [i, f, g, o] each (H, X)
        return [w[k * H:(k + 1) * H] for k in range(4)]

    # --- encoder input proj, columns gate-major / direction-minor.
    wih_f = gate_blocks(f32(params["enc_wih_f"]))
    wih_b = gate_blocks(f32(params["enc_wih_b"]))
    wenc = jnp.concatenate(
        [w.T for k in range(4) for w in (wih_f[k], wih_b[k])], axis=1)  # (D,8H)
    b_f = f32(params["enc_bih_f"] + params["enc_bhh_f"])
    b_b = f32(params["enc_bih_b"] + params["enc_bhh_b"])
    benc = jnp.concatenate(
        [b[k * H:(k + 1) * H] for k in range(4) for b in (b_f, b_b)])[None, :]

    # --- block-diagonal encoder recurrent weight (2H, 8H): rows [h_f | h_b].
    whh_f = gate_blocks(f32(params["enc_whh_f"]))
    whh_b = gate_blocks(f32(params["enc_whh_b"]))
    zhh = jnp.zeros((H, H), jnp.float32)
    blocks = []
    for k in range(4):
        blocks.append(jnp.concatenate([whh_f[k].T, zhh], axis=0))  # fwd cols
        blocks.append(jnp.concatenate([zhh, whh_b[k].T], axis=0))  # bwd cols
    wehh = jnp.concatenate(blocks, axis=1)                          # (2H, 8H)

    # --- latent Linear folded into the decoder input projection:
    #     gx_dec = [h_f|h_b] @ (lat_w.T @ dec_wih.T) + (lat_b @ dec_wih.T + b)
    wld = f32(params["lat_w"]).T @ f32(params["dec_wih"]).T        # (2H, 4H)
    bld = (f32(params["lat_b"]) @ f32(params["dec_wih"]).T
           + f32(params["dec_bih"]) + f32(params["dec_bhh"]))[None, :]
    whd = f32(params["dec_whh"]).T                                 # (H, 4H)

    # --- output Linear, lane-padded to Dp for unmasked stores.
    wout = jnp.zeros((H, Dp), jnp.float32).at[:, :D].set(f32(params["out_w"]).T)
    bout = jnp.zeros((1, Dp), jnp.float32).at[0, :D].set(f32(params["out_b"]))

    args = (x2d, wenc, benc, wehh, wld, bld, whd, wout, bout)

    out2d = pl.pallas_call(
        functools.partial(_lstm_ae_kernel, seq_len=T, batch=Bp, hidden=H),
        out_shape=jax.ShapeDtypeStruct((T * Bp, Dp), jnp.float32),
        grid=(1,),
        in_specs=[_full_spec(a) for a in args],
        out_specs=pl.BlockSpec((T * Bp, Dp), lambda i: (0, 0)),
        compiler_params=pltpu.CompilerParams(
            dimension_semantics=("arbitrary",)),
    )(*args)

    out = out2d.reshape(T, Bp, Dp)[:, :B, :D]                      # drop pads
    return jnp.transpose(out, (1, 0, 2))                           # (B, T, D)


# -----------------------------------------------------------------------------
# Pure-JAX reference (same math as the PyTorch module, no fusion).
# -----------------------------------------------------------------------------
def _ref_forward(x, params):
    H = params["enc_whh_f"].shape[1]
    B, T, D = x.shape

    def cell(x_t, h, c, wih, whh, bih, bhh):
        g = x_t @ wih.T + bih + h @ whh.T + bhh
        i = jax.nn.sigmoid(g[:, 0 * H:1 * H])
        f = jax.nn.sigmoid(g[:, 1 * H:2 * H])
        gg = jnp.tanh(g[:, 2 * H:3 * H])
        o = jax.nn.sigmoid(g[:, 3 * H:4 * H])
        c = f * c + i * gg
        return o * jnp.tanh(c), c

    h = c = jnp.zeros((B, H), jnp.float32)
    for t in range(T):
        h, c = cell(x[:, t], h, c, params["enc_wih_f"], params["enc_whh_f"],
                    params["enc_bih_f"], params["enc_bhh_f"])
    h_f = h
    h = c = jnp.zeros((B, H), jnp.float32)
    for t in range(T - 1, -1, -1):
        h, c = cell(x[:, t], h, c, params["enc_wih_b"], params["enc_whh_b"],
                    params["enc_bih_b"], params["enc_bhh_b"])
    h_b = h
    latent = jnp.concatenate([h_f, h_b], 1) @ params["lat_w"].T + params["lat_b"]
    h = c = jnp.zeros((B, H), jnp.float32)
    ys = []
    for _ in range(T):
        h, c = cell(latent, h, c, params["dec_wih"], params["dec_whh"],
                    params["dec_bih"], params["dec_bhh"])
        ys.append(h @ params["out_w"].T + params["out_b"])
    return jnp.stack(ys, axis=1)


# -----------------------------------------------------------------------------
def init_params(key, input_size, hidden_size, latent_dim):
    """Deterministic synthetic parameters with PyTorch module shapes."""
    H, D, L = hidden_size, input_size, latent_dim
    keys = jax.random.split(key, 18)
    u = lambda k, shape, s: jax.random.uniform(k, shape, jnp.float32, -s, s)
    s_h = 1.0 / jnp.sqrt(H)
    return {
        # encoder (bidirectional nn.LSTM): forward & reverse directions
        "enc_wih_f": u(keys[0], (4 * H, D), s_h),
        "enc_whh_f": u(keys[1], (4 * H, H), s_h),
        "enc_bih_f": u(keys[2], (4 * H,), s_h),
        "enc_bhh_f": u(keys[3], (4 * H,), s_h),
        "enc_wih_b": u(keys[4], (4 * H, D), s_h),
        "enc_whh_b": u(keys[5], (4 * H, H), s_h),
        "enc_bih_b": u(keys[6], (4 * H,), s_h),
        "enc_bhh_b": u(keys[7], (4 * H,), s_h),
        # latent: nn.Linear(2H, L)
        "lat_w": u(keys[8], (L, 2 * H), 1.0 / jnp.sqrt(2 * H)),
        "lat_b": u(keys[9], (L,), 1.0 / jnp.sqrt(2 * H)),
        # decoder nn.LSTM(L, H)
        "dec_wih": u(keys[10], (4 * H, L), s_h),
        "dec_whh": u(keys[11], (4 * H, H), s_h),
        "dec_bih": u(keys[12], (4 * H,), s_h),
        "dec_bhh": u(keys[13], (4 * H,), s_h),
        # decoder_out: nn.Linear(H, D)
        "out_w": u(keys[14], (D, H), s_h),
        "out_b": u(keys[15], (D,), s_h),
    }


if __name__ == "__main__":
    # model_params = {'input_size': 4, 'hidden_size': 32, 'latent_dim': 16}
    B, T, D, H, L = 2, 8, 4, 32, 16

    key = jax.random.PRNGKey(0)
    k_x, k_p = jax.random.split(key)
    x = jax.random.normal(k_x, (B, T, D), jnp.float32)
    params = init_params(k_p, input_size=D, hidden_size=H, latent_dim=L)

    out = lstm_autoencoder_forward(x, params)
    out = jax.block_until_ready(out)
    assert out.shape == (B, T, D), out.shape

    ref = _ref_forward(x, params)
    assert jnp.allclose(out, ref, rtol=1e-4, atol=1e-4), (
        float(jnp.max(jnp.abs(out - ref))))

    print("KERNEL_OK")
</pallas_src>

<mosaic_0001>
module attributes {stable_mosaic.version = 11 : i64} {
  func.func @_lstm_ae_kernel(%arg0: i32, %arg1: memref<64x4xf32, #tpu.memory_space<vmem>>, %arg2: memref<4x256xf32, #tpu.memory_space<vmem>>, %arg3: memref<1x256xf32, #tpu.memory_space<vmem>>, %arg4: memref<64x256xf32, #tpu.memory_space<vmem>>, %arg5: memref<64x128xf32, #tpu.memory_space<vmem>>, %arg6: memref<1x128xf32, #tpu.memory_space<vmem>>, %arg7: memref<32x128xf32, #tpu.memory_space<vmem>>, %arg8: memref<32x128xf32, #tpu.memory_space<vmem>>, %arg9: memref<1x128xf32, #tpu.memory_space<vmem>>, %arg10: memref<64x128xf32, #tpu.memory_space<vmem>>) attributes {dimension_semantics = [#tpu.dimension_semantics<arbitrary>], iteration_bounds = array<i64: 1>, scalar_prefetch = 0 : i64, scratch_operands = 0 : i64, tpu.core_type = #tpu.core_type<tc>, window_params = [{pipeline_mode = #tpu.pipeline_mode<synchronous>, transform_indices = @transform_0, window_bounds = array<i64: 64, 4>}, {pipeline_mode = #tpu.pipeline_mode<synchronous>, transform_indices = @transform_1, window_bounds = array<i64: 4, 256>}, {pipeline_mode = #tpu.pipeline_mode<synchronous>, transform_indices = @transform_2, window_bounds = array<i64: 1, 256>}, {pipeline_mode = #tpu.pipeline_mode<synchronous>, transform_indices = @transform_3, window_bounds = array<i64: 64, 256>}, {pipeline_mode = #tpu.pipeline_mode<synchronous>, transform_indices = @transform_4, window_bounds = array<i64: 64, 128>}, {pipeline_mode = #tpu.pipeline_mode<synchronous>, transform_indices = @transform_5, window_bounds = array<i64: 1, 128>}, {pipeline_mode = #tpu.pipeline_mode<synchronous>, transform_indices = @transform_6, window_bounds = array<i64: 32, 128>}, {pipeline_mode = #tpu.pipeline_mode<synchronous>, transform_indices = @transform_7, window_bounds = array<i64: 32, 128>}, {pipeline_mode = #tpu.pipeline_mode<synchronous>, transform_indices = @transform_8, window_bounds = array<i64: 1, 128>}, {pipeline_mode = #tpu.pipeline_mode<synchronous>, transform_indices = @transform_9, window_bounds = array<i64: 64, 128>}]} {
    %c0 = arith.constant 0 : index
    %c0_0 = arith.constant 0 : index
    %0 = vector.load %arg4[%c0, %c0_0] : memref<64x256xf32, #tpu.memory_space<vmem>>, vector<64x256xf32>
    %c0_1 = arith.constant 0 : index
    %c0_2 = arith.constant 0 : index
    %1 = vector.load %arg7[%c0_1, %c0_2] : memref<32x128xf32, #tpu.memory_space<vmem>>, vector<32x128xf32>
    %c0_3 = arith.constant 0 : index
    %c0_4 = arith.constant 0 : index
    %2 = vector.load %arg8[%c0_3, %c0_4] : memref<32x128xf32, #tpu.memory_space<vmem>>, vector<32x128xf32>
    %c0_5 = arith.constant 0 : index
    %c0_6 = arith.constant 0 : index
    %3 = vector.load %arg1[%c0_5, %c0_6] : memref<64x4xf32, #tpu.memory_space<vmem>>, vector<64x4xf32>
    %c0_7 = arith.constant 0 : index
    %c0_8 = arith.constant 0 : index
    %4 = vector.load %arg2[%c0_7, %c0_8] : memref<4x256xf32, #tpu.memory_space<vmem>>, vector<4x256xf32>
    %cst = arith.constant dense<0.000000e+00> : vector<64x256xf32>
    %5 = tpu.matmul %3, %4, %cst {dimension_numbers = #tpu.dot_dimension_numbers<[1], [0], [0], [1], [0, 0, 1, 1], [], []>} : vector<64x4xf32>, vector<4x256xf32>, vector<64x256xf32> -> vector<64x256xf32>
    %c0_9 = arith.constant 0 : index
    %c0_10 = arith.constant 0 : index
    %6 = vector.load %arg3[%c0_9, %c0_10] : memref<1x256xf32, #tpu.memory_space<vmem>>, vector<1x256xf32>
    %7 = vector.broadcast %6 : vector<1x256xf32> to vector<64x256xf32>
    %8 = arith.addf %5, %7 : vector<64x256xf32>
    %9 = tpu.iota {dimensions = array<i32: 1>} : vector<8x256xi32>
    %c64_i32 = arith.constant 64 : i32
    %c0_i32 = arith.constant 0 : i32
    %10 = arith.cmpi eq, %c64_i32, %c0_i32 : i32
    %c1_i32 = arith.constant 1 : i32
    %11 = arith.select %10, %c1_i32, %c64_i32 : i32
    %12 = vector.broadcast %11 : i32 to vector<8x256xi32>
    %13 = arith.remsi %9, %12 : vector<8x256xi32>
    %c0_i32_11 = arith.constant 0 : i32
    %14 = vector.broadcast %c0_i32_11 : i32 to vector<8x256xi32>
    %15 = arith.cmpi ne, %13, %14 : vector<8x256xi32>
    %c0_i32_12 = arith.constant 0 : i32
    %16 = vector.broadcast %c0_i32_12 : i32 to vector<8x256xi32>
    %17 = arith.cmpi slt, %13, %16 : vector<8x256xi32>
    %c0_i32_13 = arith.constant 0 : i32
    %18 = arith.cmpi slt, %11, %c0_i32_13 : i32
    %19 = vector.broadcast %18 : i1 to vector<8x256xi1>
    %20 = vector.broadcast %19 : vector<8x256xi1> to vector<8x256xi1>
    %21 = arith.xori %17, %20 : vector<8x256xi1>
    %22 = arith.andi %21, %15 : vector<8x256xi1>
    %23 = vector.broadcast %11 : i32 to vector<8x256xi32>
    %24 = arith.addi %13, %23 : vector<8x256xi32>
    %25 = arith.select %22, %24, %13 : vector<8x256xi1>, vector<8x256xi32>
    %c32_i32 = arith.constant 32 : i32
    %26 = vector.broadcast %c32_i32 : i32 to vector<8x256xi32>
    %27 = arith.cmpi slt, %25, %26 : vector<8x256xi32>
    %28 = vector.extract_strided_slice %8 {offsets = [0, 0], sizes = [8, 256], strides = [1, 1]} : vector<64x256xf32> to vector<8x256xf32>
    %29 = vector.extract_strided_slice %8 {offsets = [56, 0], sizes = [8, 256], strides = [1, 1]} : vector<64x256xf32> to vector<8x256xf32>
    %30 = arith.select %27, %28, %29 : vector<8x256xi1>, vector<8x256xf32>
    %31 = arith.negf %30 : vector<8x256xf32>
    %32 = math.exp %31 : vector<8x256xf32>
    %cst_14 = arith.constant 1.000000e+00 : f32
    %33 = vector.broadcast %cst_14 : f32 to vector<8x256xf32>
    %34 = arith.addf %33, %32 : vector<8x256xf32>
    %35 = arith.divf %33, %34 : vector<8x256xf32>
    %36 = vector.extract_strided_slice %35 {offsets = [0, 0], sizes = [8, 64], strides = [1, 1]} : vector<8x256xf32> to vector<8x64xf32>
    %37 = vector.extract_strided_slice %35 {offsets = [0, 192], sizes = [8, 64], strides = [1, 1]} : vector<8x256xf32> to vector<8x64xf32>
    %38 = vector.extract_strided_slice %30 {offsets = [0, 128], sizes = [8, 64], strides = [1, 1]} : vector<8x256xf32> to vector<8x64xf32>
    %39 = math.tanh %38 : vector<8x64xf32>
    %40 = arith.mulf %36, %39 : vector<8x64xf32>
    %41 = math.tanh %40 : vector<8x64xf32>
    %42 = arith.mulf %37, %41 : vector<8x64xf32>
    %43 = vector.extract_strided_slice %8 {offsets = [8, 0], sizes = [8, 256], strides = [1, 1]} : vector<64x256xf32> to vector<8x256xf32>
    %44 = vector.extract_strided_slice %8 {offsets = [48, 0], sizes = [8, 256], strides = [1, 1]} : vector<64x256xf32> to vector<8x256xf32>
    %45 = arith.select %27, %43, %44 : vector<8x256xi1>, vector<8x256xf32>
    %cst_15 = arith.constant dense<0.000000e+00> : vector<8x256xf32>
    %46 = tpu.matmul %42, %0, %cst_15 {dimension_numbers = #tpu.dot_dimension_numbers<[1], [0], [0], [1], [0, 0, 1, 1], [], []>} : vector<8x64xf32>, vector<64x256xf32>, vector<8x256xf32> -> vector<8x256xf32>
    %47 = arith.addf %45, %46 : vector<8x256xf32>
    %48 = arith.negf %47 : vector<8x256xf32>
    %49 = math.exp %48 : vector<8x256xf32>
    %cst_16 = arith.constant 1.000000e+00 : f32
    %50 = vector.broadcast %cst_16 : f32 to vector<8x256xf32>
    %51 = arith.addf %50, %49 : vector<8x256xf32>
    %52 = arith.divf %50, %51 : vector<8x256xf32>
    %53 = vector.extract_strided_slice %52 {offsets = [0, 0], sizes = [8, 64], strides = [1, 1]} : vector<8x256xf32> to vector<8x64xf32>
    %54 = vector.extract_strided_slice %52 {offsets = [0, 64], sizes = [8, 64], strides = [1, 1]} : vector<8x256xf32> to vector<8x64xf32>
    %55 = vector.extract_strided_slice %52 {offsets = [0, 192], sizes = [8, 64], strides = [1, 1]} : vector<8x256xf32> to vector<8x64xf32>
    %56 = vector.extract_strided_slice %47 {offsets = [0, 128], sizes = [8, 64], strides = [1, 1]} : vector<8x256xf32> to vector<8x64xf32>
    %57 = math.tanh %56 : vector<8x64xf32>
    %58 = arith.mulf %54, %40 : vector<8x64xf32>
    %59 = arith.mulf %53, %57 : vector<8x64xf32>
    %60 = arith.addf %58, %59 : vector<8x64xf32>
    %61 = math.tanh %60 : vector<8x64xf32>
    %62 = arith.mulf %55, %61 : vector<8x64xf32>
    %63 = vector.extract_strided_slice %8 {offsets = [16, 0], sizes = [8, 256], strides = [1, 1]} : vector<64x256xf32> to vector<8x256xf32>
    %64 = vector.extract_strided_slice %8 {offsets = [40, 0], sizes = [8, 256], strides = [1, 1]} : vector<64x256xf32> to vector<8x256xf32>
    %65 = arith.select %27, %63, %64 : vector<8x256xi1>, vector<8x256xf32>
    %cst_17 = arith.constant dense<0.000000e+00> : vector<8x256xf32>
    %66 = tpu.matmul %62, %0, %cst_17 {dimension_numbers = #tpu.dot_dimension_numbers<[1], [0], [0], [1], [0, 0, 1, 1], [], []>} : vector<8x64xf32>, vector<64x256xf32>, vector<8x256xf32> -> vector<8x256xf32>
    %67 = arith.addf %65, %66 : vector<8x256xf32>
    %68 = arith.negf %67 : vector<8x256xf32>
    %69 = math.exp %68 : vector<8x256xf32>
    %cst_18 = arith.constant 1.000000e+00 : f32
    %70 = vector.broadcast %cst_18 : f32 to vector<8x256xf32>
    %71 = arith.addf %70, %69 : vector<8x256xf32>
    %72 = arith.divf %70, %71 : vector<8x256xf32>
    %73 = vector.extract_strided_slice %72 {offsets = [0, 0], sizes = [8, 64], strides = [1, 1]} : vector<8x256xf32> to vector<8x64xf32>
    %74 = vector.extract_strided_slice %72 {offsets = [0, 64], sizes = [8, 64], strides = [1, 1]} : vector<8x256xf32> to vector<8x64xf32>
    %75 = vector.extract_strided_slice %72 {offsets = [0, 192], sizes = [8, 64], strides = [1, 1]} : vector<8x256xf32> to vector<8x64xf32>
    %76 = vector.extract_strided_slice %67 {offsets = [0, 128], sizes = [8, 64], strides = [1, 1]} : vector<8x256xf32> to vector<8x64xf32>
    %77 = math.tanh %76 : vector<8x64xf32>
    %78 = arith.mulf %74, %60 : vector<8x64xf32>
    %79 = arith.mulf %73, %77 : vector<8x64xf32>
    %80 = arith.addf %78, %79 : vector<8x64xf32>
    %81 = math.tanh %80 : vector<8x64xf32>
    %82 = arith.mulf %75, %81 : vector<8x64xf32>
    %83 = vector.extract_strided_slice %8 {offsets = [24, 0], sizes = [8, 256], strides = [1, 1]} : vector<64x256xf32> to vector<8x256xf32>
    %84 = vector.extract_strided_slice %8 {offsets = [32, 0], sizes = [8, 256], strides = [1, 1]} : vector<64x256xf32> to vector<8x256xf32>
    %85 = arith.select %27, %83, %84 : vector<8x256xi1>, vector<8x256xf32>
    %cst_19 = arith.constant dense<0.000000e+00> : vector<8x256xf32>
    %86 = tpu.matmul %82, %0, %cst_19 {dimension_numbers = #tpu.dot_dimension_numbers<[1], [0], [0], [1], [0, 0, 1, 1], [], []>} : vector<8x64xf32>, vector<64x256xf32>, vector<8x256xf32> -> vector<8x256xf32>
    %87 = arith.addf %85, %86 : vector<8x256xf32>
    %88 = arith.negf %87 : vector<8x256xf32>
    %89 = math.exp %88 : vector<8x256xf32>
    %cst_20 = arith.constant 1.000000e+00 : f32
    %90 = vector.broadcast %cst_20 : f32 to vector<8x256xf32>
    %91 = arith.addf %90, %89 : vector<8x256xf32>
    %92 = arith.divf %90, %91 : vector<8x256xf32>
    %93 = vector.extract_strided_slice %92 {offsets = [0, 0], sizes = [8, 64], strides = [1, 1]} : vector<8x256xf32> to vector<8x64xf32>
    %94 = vector.extract_strided_slice %92 {offsets = [0, 64], sizes = [8, 64], strides = [1, 1]} : vector<8x256xf32> to vector<8x64xf32>
    %95 = vector.extract_strided_slice %92 {offsets = [0, 192], sizes = [8, 64], strides = [1, 1]} : vector<8x256xf32> to vector<8x64xf32>
    %96 = vector.extract_strided_slice %87 {offsets = [0, 128], sizes = [8, 64], strides = [1, 1]} : vector<8x256xf32> to vector<8x64xf32>
    %97 = math.tanh %96 : vector<8x64xf32>
    %98 = arith.mulf %94, %80 : vector<8x64xf32>
    %99 = arith.mulf %93, %97 : vector<8x64xf32>
    %100 = arith.addf %98, %99 : vector<8x64xf32>
    %101 = math.tanh %100 : vector<8x64xf32>
    %102 = arith.mulf %95, %101 : vector<8x64xf32>
    %103 = vector.extract_strided_slice %8 {offsets = [32, 0], sizes = [8, 256], strides = [1, 1]} : vector<64x256xf32> to vector<8x256xf32>
    %104 = vector.extract_strided_slice %8 {offsets = [24, 0], sizes = [8, 256], strides = [1, 1]} : vector<64x256xf32> to vector<8x256xf32>
    %105 = arith.select %27, %103, %104 : vector<8x256xi1>, vector<8x256xf32>
    %cst_21 = arith.constant dense<0.000000e+00> : vector<8x256xf32>
    %106 = tpu.matmul %102, %0, %cst_21 {dimension_numbers = #tpu.dot_dimension_numbers<[1], [0], [0], [1], [0, 0, 1, 1], [], []>} : vector<8x64xf32>, vector<64x256xf32>, vector<8x256xf32> -> vector<8x256xf32>
    %107 = arith.addf %105, %106 : vector<8x256xf32>
    %108 = arith.negf %107 : vector<8x256xf32>
    %109 = math.exp %108 : vector<8x256xf32>
    %cst_22 = arith.constant 1.000000e+00 : f32
    %110 = vector.broadcast %cst_22 : f32 to vector<8x256xf32>
    %111 = arith.addf %110, %109 : vector<8x256xf32>
    %112 = arith.divf %110, %111 : vector<8x256xf32>
    %113 = vector.extract_strided_slice %112 {offsets = [0, 0], sizes = [8, 64], strides = [1, 1]} : vector<8x256xf32> to vector<8x64xf32>
    %114 = vector.extract_strided_slice %112 {offsets = [0, 64], sizes = [8, 64], strides = [1, 1]} : vector<8x256xf32> to vector<8x64xf32>
    %115 = vector.extract_strided_slice %112 {offsets = [0, 192], sizes = [8, 64], strides = [1, 1]} : vector<8x256xf32> to vector<8x64xf32>
    %116 = vector.extract_strided_slice %107 {offsets = [0, 128], sizes = [8, 64], strides = [1, 1]} : vector<8x256xf32> to vector<8x64xf32>
    %117 = math.tanh %116 : vector<8x64xf32>
    %118 = arith.mulf %114, %100 : vector<8x64xf32>
    %119 = arith.mulf %113, %117 : vector<8x64xf32>
    %120 = arith.addf %118, %119 : vector<8x64xf32>
    %121 = math.tanh %120 : vector<8x64xf32>
    %122 = arith.mulf %115, %121 : vector<8x64xf32>
    %123 = vector.extract_strided_slice %8 {offsets = [40, 0], sizes = [8, 256], strides = [1, 1]} : vector<64x256xf32> to vector<8x256xf32>
    %124 = vector.extract_strided_slice %8 {offsets = [16, 0], sizes = [8, 256], strides = [1, 1]} : vector<64x256xf32> to vector<8x256xf32>
    %125 = arith.select %27, %123, %124 : vector<8x256xi1>, vector<8x256xf32>
    %cst_23 = arith.constant dense<0.000000e+00> : vector<8x256xf32>
    %126 = tpu.matmul %122, %0, %cst_23 {dimension_numbers = #tpu.dot_dimension_numbers<[1], [0], [0], [1], [0, 0, 1, 1], [], []>} : vector<8x64xf32>, vector<64x256xf32>, vector<8x256xf32> -> vector<8x256xf32>
    %127 = arith.addf %125, %126 : vector<8x256xf32>
    %128 = arith.negf %127 : vector<8x256xf32>
    %129 = math.exp %128 : vector<8x256xf32>
    %cst_24 = arith.constant 1.000000e+00 : f32
    %130 = vector.broadcast %cst_24 : f32 to vector<8x256xf32>
    %131 = arith.addf %130, %129 : vector<8x256xf32>
    %132 = arith.divf %130, %131 : vector<8x256xf32>
    %133 = vector.extract_strided_slice %132 {offsets = [0, 0], sizes = [8, 64], strides = [1, 1]} : vector<8x256xf32> to vector<8x64xf32>
    %134 = vector.extract_strided_slice %132 {offsets = [0, 64], sizes = [8, 64], strides = [1, 1]} : vector<8x256xf32> to vector<8x64xf32>
    %135 = vector.extract_strided_slice %132 {offsets = [0, 192], sizes = [8, 64], strides = [1, 1]} : vector<8x256xf32> to vector<8x64xf32>
    %136 = vector.extract_strided_slice %127 {offsets = [0, 128], sizes = [8, 64], strides = [1, 1]} : vector<8x256xf32> to vector<8x64xf32>
    %137 = math.tanh %136 : vector<8x64xf32>
    %138 = arith.mulf %134, %120 : vector<8x64xf32>
    %139 = arith.mulf %133, %137 : vector<8x64xf32>
    %140 = arith.addf %138, %139 : vector<8x64xf32>
    %141 = math.tanh %140 : vector<8x64xf32>
    %142 = arith.mulf %135, %141 : vector<8x64xf32>
    %143 = vector.extract_strided_slice %8 {offsets = [48, 0], sizes = [8, 256], strides = [1, 1]} : vector<64x256xf32> to vector<8x256xf32>
    %144 = vector.extract_strided_slice %8 {offsets = [8, 0], sizes = [8, 256], strides = [1, 1]} : vector<64x256xf32> to vector<8x256xf32>
    %145 = arith.select %27, %143, %144 : vector<8x256xi1>, vector<8x256xf32>
    %cst_25 = arith.constant dense<0.000000e+00> : vector<8x256xf32>
    %146 = tpu.matmul %142, %0, %cst_25 {dimension_numbers = #tpu.dot_dimension_numbers<[1], [0], [0], [1], [0, 0, 1, 1], [], []>} : vector<8x64xf32>, vector<64x256xf32>, vector<8x256xf32> -> vector<8x256xf32>
    %147 = arith.addf %145, %146 : vector<8x256xf32>
    %148 = arith.negf %147 : vector<8x256xf32>
    %149 = math.exp %148 : vector<8x256xf32>
    %cst_26 = arith.constant 1.000000e+00 : f32
    %150 = vector.broadcast %cst_26 : f32 to vector<8x256xf32>
    %151 = arith.addf %150, %149 : vector<8x256xf32>
    %152 = arith.divf %150, %151 : vector<8x256xf32>
    %153 = vector.extract_strided_slice %152 {offsets = [0, 0], sizes = [8, 64], strides = [1, 1]} : vector<8x256xf32> to vector<8x64xf32>
    %154 = vector.extract_strided_slice %152 {offsets = [0, 64], sizes = [8, 64], strides = [1, 1]} : vector<8x256xf32> to vector<8x64xf32>
    %155 = vector.extract_strided_slice %152 {offsets = [0, 192], sizes = [8, 64], strides = [1, 1]} : vector<8x256xf32> to vector<8x64xf32>
    %156 = vector.extract_strided_slice %147 {offsets = [0, 128], sizes = [8, 64], strides = [1, 1]} : vector<8x256xf32> to vector<8x64xf32>
    %157 = math.tanh %156 : vector<8x64xf32>
    %158 = arith.mulf %154, %140 : vector<8x64xf32>
    %159 = arith.mulf %153, %157 : vector<8x64xf32>
    %160 = arith.addf %158, %159 : vector<8x64xf32>
    %161 = math.tanh %160 : vector<8x64xf32>
    %162 = arith.mulf %155, %161 : vector<8x64xf32>
    %163 = vector.extract_strided_slice %8 {offsets = [56, 0], sizes = [8, 256], strides = [1, 1]} : vector<64x256xf32> to vector<8x256xf32>
    %164 = vector.extract_strided_slice %8 {offsets = [0, 0], sizes = [8, 256], strides = [1, 1]} : vector<64x256xf32> to vector<8x256xf32>
    %165 = arith.select %27, %163, %164 : vector<8x256xi1>, vector<8x256xf32>
    %cst_27 = arith.constant dense<0.000000e+00> : vector<8x256xf32>
    %166 = tpu.matmul %162, %0, %cst_27 {dimension_numbers = #tpu.dot_dimension_numbers<[1], [0], [0], [1], [0, 0, 1, 1], [], []>} : vector<8x64xf32>, vector<64x256xf32>, vector<8x256xf32> -> vector<8x256xf32>
    %167 = arith.addf %165, %166 : vector<8x256xf32>
    %168 = arith.negf %167 : vector<8x256xf32>
    %169 = math.exp %168 : vector<8x256xf32>
    %cst_28 = arith.constant 1.000000e+00 : f32
    %170 = vector.broadcast %cst_28 : f32 to vector<8x256xf32>
    %171 = arith.addf %170, %169 : vector<8x256xf32>
    %172 = arith.divf %170, %171 : vector<8x256xf32>
    %173 = vector.extract_strided_slice %172 {offsets = [0, 0], sizes = [8, 64], strides = [1, 1]} : vector<8x256xf32> to vector<8x64xf32>
    %174 = vector.extract_strided_slice %172 {offsets = [0, 64], sizes = [8, 64], strides = [1, 1]} : vector<8x256xf32> to vector<8x64xf32>
    %175 = vector.extract_strided_slice %172 {offsets = [0, 192], sizes = [8, 64], strides = [1, 1]} : vector<8x256xf32> to vector<8x64xf32>
    %176 = vector.extract_strided_slice %167 {offsets = [0, 128], sizes = [8, 64], strides = [1, 1]} : vector<8x256xf32> to vector<8x64xf32>
    %177 = math.tanh %176 : vector<8x64xf32>
    %178 = arith.mulf %174, %160 : vector<8x64xf32>
    %179 = arith.mulf %173, %177 : vector<8x64xf32>
    %180 = arith.addf %178, %179 : vector<8x64xf32>
    %181 = math.tanh %180 : vector<8x64xf32>
    %182 = arith.mulf %175, %181 : vector<8x64xf32>
    %c0_29 = arith.constant 0 : index
    %c0_30 = arith.constant 0 : index
    %183 = vector.load %arg5[%c0_29, %c0_30] : memref<64x128xf32, #tpu.memory_space<vmem>>, vector<64x128xf32>
    %cst_31 = arith.constant dense<0.000000e+00> : vector<8x128xf32>
    %184 = tpu.matmul %182, %183, %cst_31 {dimension_numbers = #tpu.dot_dimension_numbers<[1], [0], [0], [1], [0, 0, 1, 1], [], []>} : vector<8x64xf32>, vector<64x128xf32>, vector<8x128xf32> -> vector<8x128xf32>
    %c0_32 = arith.constant 0 : index
    %c0_33 = arith.constant 0 : index
    %185 = vector.load %arg6[%c0_32, %c0_33] : memref<1x128xf32, #tpu.memory_space<vmem>>, vector<1x128xf32>
    %186 = vector.broadcast %185 : vector<1x128xf32> to vector<8x128xf32>
    %187 = arith.addf %184, %186 : vector<8x128xf32>
    %c0_34 = arith.constant 0 : index
    %c0_35 = arith.constant 0 : index
    %188 = vector.load %arg9[%c0_34, %c0_35] : memref<1x128xf32, #tpu.memory_space<vmem>>, vector<1x128xf32>
    %189 = vector.shape_cast %188 : vector<1x128xf32> to vector<1x128xf32>
    %190 = vector.broadcast %189 : vector<1x128xf32> to vector<8x128xf32>
    %191 = arith.negf %187 : vector<8x128xf32>
    %192 = math.exp %191 : vector<8x128xf32>
    %cst_36 = arith.constant 1.000000e+00 : f32
    %193 = vector.broadcast %cst_36 : f32 to vector<8x128xf32>
    %194 = arith.addf %193, %192 : vector<8x128xf32>
    %195 = arith.divf %193, %194 : vector<8x128xf32>
    %196 = vector.extract_strided_slice %195 {offsets = [0, 0], sizes = [8, 32], strides = [1, 1]} : vector<8x128xf32> to vector<8x32xf32>
    %197 = vector.extract_strided_slice %195 {offsets = [0, 96], sizes = [8, 32], strides = [1, 1]} : vector<8x128xf32> to vector<8x32xf32>
    %198 = vector.extract_strided_slice %187 {offsets = [0, 64], sizes = [8, 32], strides = [1, 1]} : vector<8x128xf32> to vector<8x32xf32>
    %199 = math.tanh %198 : vector<8x32xf32>
    %200 = arith.mulf %196, %199 : vector<8x32xf32>
    %201 = math.tanh %200 : vector<8x32xf32>
    %202 = arith.mulf %197, %201 : vector<8x32xf32>
    %cst_37 = arith.constant dense<0.000000e+00> : vector<8x128xf32>
    %203 = tpu.matmul %202, %2, %cst_37 {dimension_numbers = #tpu.dot_dimension_numbers<[1], [0], [0], [1], [0, 0, 1, 1], [], []>} : vector<8x32xf32>, vector<32x128xf32>, vector<8x128xf32> -> vector<8x128xf32>
    %204 = arith.addf %203, %190 : vector<8x128xf32>
    %c0_38 = arith.constant 0 : index
    %c0_39 = arith.constant 0 : index
    %205 = vector.load %arg10[%c0_38, %c0_39] : memref<64x128xf32, #tpu.memory_space<vmem>>, vector<8x128xf32>
    tpu.vector_store %arg10[%c0_38, %c0_39], %204 {strides = array<i32>} : memref<64x128xf32, #tpu.memory_space<vmem>>, vector<8x128xf32>,
    %cst_40 = arith.constant dense<0.000000e+00> : vector<8x128xf32>
    %206 = tpu.matmul %202, %1, %cst_40 {dimension_numbers = #tpu.dot_dimension_numbers<[1], [0], [0], [1], [0, 0, 1, 1], [], []>} : vector<8x32xf32>, vector<32x128xf32>, vector<8x128xf32> -> vector<8x128xf32>
    %207 = arith.addf %187, %206 : vector<8x128xf32>
    %208 = arith.negf %207 : vector<8x128xf32>
    %209 = math.exp %208 : vector<8x128xf32>
    %cst_41 = arith.constant 1.000000e+00 : f32
    %210 = vector.broadcast %cst_41 : f32 to vector<8x128xf32>
    %211 = arith.addf %210, %209 : vector<8x128xf32>
    %212 = arith.divf %210, %211 : vector<8x128xf32>
    %213 = vector.extract_strided_slice %212 {offsets = [0, 0], sizes = [8, 32], strides = [1, 1]} : vector<8x128xf32> to vector<8x32xf32>
    %214 = vector.extract_strided_slice %212 {offsets = [0, 32], sizes = [8, 32], strides = [1, 1]} : vector<8x128xf32> to vector<8x32xf32>
    %215 = vector.extract_strided_slice %212 {offsets = [0, 96], sizes = [8, 32], strides = [1, 1]} : vector<8x128xf32> to vector<8x32xf32>
    %216 = vector.extract_strided_slice %207 {offsets = [0, 64], sizes = [8, 32], strides = [1, 1]} : vector<8x128xf32> to vector<8x32xf32>
    %217 = math.tanh %216 : vector<8x32xf32>
    %218 = arith.mulf %214, %200 : vector<8x32xf32>
    %219 = arith.mulf %213, %217 : vector<8x32xf32>
    %220 = arith.addf %218, %219 : vector<8x32xf32>
    %221 = math.tanh %220 : vector<8x32xf32>
    %222 = arith.mulf %215, %221 : vector<8x32xf32>
    %cst_42 = arith.constant dense<0.000000e+00> : vector<8x128xf32>
    %223 = tpu.matmul %222, %2, %cst_42 {dimension_numbers = #tpu.dot_dimension_numbers<[1], [0], [0], [1], [0, 0, 1, 1], [], []>} : vector<8x32xf32>, vector<32x128xf32>, vector<8x128xf32> -> vector<8x128xf32>
    %224 = arith.addf %223, %190 : vector<8x128xf32>
    %c8 = arith.constant 8 : index
    %c0_43 = arith.constant 0 : index
    %225 = vector.load %arg10[%c8, %c0_43] : memref<64x128xf32, #tpu.memory_space<vmem>>, vector<8x128xf32>
    tpu.vector_store %arg10[%c8, %c0_43], %224 {strides = array<i32>} : memref<64x128xf32, #tpu.memory_space<vmem>>, vector<8x128xf32>,
    %cst_44 = arith.constant dense<0.000000e+00> : vector<8x128xf32>
    %226 = tpu.matmul %222, %1, %cst_44 {dimension_numbers = #tpu.dot_dimension_numbers<[1], [0], [0], [1], [0, 0, 1, 1], [], []>} : vector<8x32xf32>, vector<32x128xf32>, vector<8x128xf32> -> vector<8x128xf32>
    %227 = arith.addf %187, %226 : vector<8x128xf32>
    %228 = arith.negf %227 : vector<8x128xf32>
    %229 = math.exp %228 : vector<8x128xf32>
    %cst_45 = arith.constant 1.000000e+00 : f32
    %230 = vector.broadcast %cst_45 : f32 to vector<8x128xf32>
    %231 = arith.addf %230, %229 : vector<8x128xf32>
    %232 = arith.divf %230, %231 : vector<8x128xf32>
    %233 = vector.extract_strided_slice %232 {offsets = [0, 0], sizes = [8, 32], strides = [1, 1]} : vector<8x128xf32> to vector<8x32xf32>
    %234 = vector.extract_strided_slice %232 {offsets = [0, 32], sizes = [8, 32], strides = [1, 1]} : vector<8x128xf32> to vector<8x32xf32>
    %235 = vector.extract_strided_slice %232 {offsets = [0, 96], sizes = [8, 32], strides = [1, 1]} : vector<8x128xf32> to vector<8x32xf32>
    %236 = vector.extract_strided_slice %227 {offsets = [0, 64], sizes = [8, 32], strides = [1, 1]} : vector<8x128xf32> to vector<8x32xf32>
    %237 = math.tanh %236 : vector<8x32xf32>
    %238 = arith.mulf %234, %220 : vector<8x32xf32>
    %239 = arith.mulf %233, %237 : vector<8x32xf32>
    %240 = arith.addf %238, %239 : vector<8x32xf32>
    %241 = math.tanh %240 : vector<8x32xf32>
    %242 = arith.mulf %235, %241 : vector<8x32xf32>
    %cst_46 = arith.constant dense<0.000000e+00> : vector<8x128xf32>
    %243 = tpu.matmul %242, %2, %cst_46 {dimension_numbers = #tpu.dot_dimension_numbers<[1], [0], [0], [1], [0, 0, 1, 1], [], []>} : vector<8x32xf32>, vector<32x128xf32>, vector<8x128xf32> -> vector<8x128xf32>
    %244 = arith.addf %243, %190 : vector<8x128xf32>
    %c16 = arith.constant 16 : index
    %c0_47 = arith.constant 0 : index
    %245 = vector.load %arg10[%c16, %c0_47] : memref<64x128xf32, #tpu.memory_space<vmem>>, vector<8x128xf32>
    tpu.vector_store %arg10[%c16, %c0_47], %244 {strides = array<i32>} : memref<64x128xf32, #tpu.memory_space<vmem>>, vector<8x128xf32>,
    %cst_48 = arith.constant dense<0.000000e+00> : vector<8x128xf32>
    %246 = tpu.matmul %242, %1, %cst_48 {dimension_numbers = #tpu.dot_dimension_numbers<[1], [0], [0], [1], [0, 0, 1, 1], [], []>} : vector<8x32xf32>, vector<32x128xf32>, vector<8x128xf32> -> vector<8x128xf32>
    %247 = arith.addf %187, %246 : vector<8x128xf32>
    %248 = arith.negf %247 : vector<8x128xf32>
    %249 = math.exp %248 : vector<8x128xf32>
    %cst_49 = arith.constant 1.000000e+00 : f32
    %250 = vector.broadcast %cst_49 : f32 to vector<8x128xf32>
    %251 = arith.addf %250, %249 : vector<8x128xf32>
    %252 = arith.divf %250, %251 : vector<8x128xf32>
    %253 = vector.extract_strided_slice %252 {offsets = [0, 0], sizes = [8, 32], strides = [1, 1]} : vector<8x128xf32> to vector<8x32xf32>
    %254 = vector.extract_strided_slice %252 {offsets = [0, 32], sizes = [8, 32], strides = [1, 1]} : vector<8x128xf32> to vector<8x32xf32>
    %255 = vector.extract_strided_slice %252 {offsets = [0, 96], sizes = [8, 32], strides = [1, 1]} : vector<8x128xf32> to vector<8x32xf32>
    %256 = vector.extract_strided_slice %247 {offsets = [0, 64], sizes = [8, 32], strides = [1, 1]} : vector<8x128xf32> to vector<8x32xf32>
    %257 = math.tanh %256 : vector<8x32xf32>
    %258 = arith.mulf %254, %240 : vector<8x32xf32>
    %259 = arith.mulf %253, %257 : vector<8x32xf32>
    %260 = arith.addf %258, %259 : vector<8x32xf32>
    %261 = math.tanh %260 : vector<8x32xf32>
    %262 = arith.mulf %255, %261 : vector<8x32xf32>
    %cst_50 = arith.constant dense<0.000000e+00> : vector<8x128xf32>
    %263 = tpu.matmul %262, %2, %cst_50 {dimension_numbers = #tpu.dot_dimension_numbers<[1], [0], [0], [1], [0, 0, 1, 1], [], []>} : vector<8x32xf32>, vector<32x128xf32>, vector<8x128xf32> -> vector<8x128xf32>
    %264 = arith.addf %263, %190 : vector<8x128xf32>
    %c24 = arith.constant 24 : index
    %c0_51 = arith.constant 0 : index
    %265 = vector.load %arg10[%c24, %c0_51] : memref<64x128xf32, #tpu.memory_space<vmem>>, vector<8x128xf32>
    tpu.vector_store %arg10[%c24, %c0_51], %264 {strides = array<i32>} : memref<64x128xf32, #tpu.memory_space<vmem>>, vector<8x128xf32>,
    %cst_52 = arith.constant dense<0.000000e+00> : vector<8x128xf32>
    %266 = tpu.matmul %262, %1, %cst_52 {dimension_numbers = #tpu.dot_dimension_numbers<[1], [0], [0], [1], [0, 0, 1, 1], [], []>} : vector<8x32xf32>, vector<32x128xf32>, vector<8x128xf32> -> vector<8x128xf32>
    %267 = arith.addf %187, %266 : vector<8x128xf32>
    %268 = arith.negf %267 : vector<8x128xf32>
    %269 = math.exp %268 : vector<8x128xf32>
    %cst_53 = arith.constant 1.000000e+00 : f32
    %270 = vector.broadcast %cst_53 : f32 to vector<8x128xf32>
    %271 = arith.addf %270, %269 : vector<8x128xf32>
    %272 = arith.divf %270, %271 : vector<8x128xf32>
    %273 = vector.extract_strided_slice %272 {offsets = [0, 0], sizes = [8, 32], strides = [1, 1]} : vector<8x128xf32> to vector<8x32xf32>
    %274 = vector.extract_strided_slice %272 {offsets = [0, 32], sizes = [8, 32], strides = [1, 1]} : vector<8x128xf32> to vector<8x32xf32>
    %275 = vector.extract_strided_slice %272 {offsets = [0, 96], sizes = [8, 32], strides = [1, 1]} : vector<8x128xf32> to vector<8x32xf32>
    %276 = vector.extract_strided_slice %267 {offsets = [0, 64], sizes = [8, 32], strides = [1, 1]} : vector<8x128xf32> to vector<8x32xf32>
    %277 = math.tanh %276 : vector<8x32xf32>
    %278 = arith.mulf %274, %260 : vector<8x32xf32>
    %279 = arith.mulf %273, %277 : vector<8x32xf32>
    %280 = arith.addf %278, %279 : vector<8x32xf32>
    %281 = math.tanh %280 : vector<8x32xf32>
    %282 = arith.mulf %275, %281 : vector<8x32xf32>
    %cst_54 = arith.constant dense<0.000000e+00> : vector<8x128xf32>
    %283 = tpu.matmul %282, %2, %cst_54 {dimension_numbers = #tpu.dot_dimension_numbers<[1], [0], [0], [1], [0, 0, 1, 1], [], []>} : vector<8x32xf32>, vector<32x128xf32>, vector<8x128xf32> -> vector<8x128xf32>
    %284 = arith.addf %283, %190 : vector<8x128xf32>
    %c32 = arith.constant 32 : index
    %c0_55 = arith.constant 0 : index
    %285 = vector.load %arg10[%c32, %c0_55] : memref<64x128xf32, #tpu.memory_space<vmem>>, vector<8x128xf32>
    tpu.vector_store %arg10[%c32, %c0_55], %284 {strides = array<i32>} : memref<64x128xf32, #tpu.memory_space<vmem>>, vector<8x128xf32>,
    %cst_56 = arith.constant dense<0.000000e+00> : vector<8x128xf32>
    %286 = tpu.matmul %282, %1, %cst_56 {dimension_numbers = #tpu.dot_dimension_numbers<[1], [0], [0], [1], [0, 0, 1, 1], [], []>} : vector<8x32xf32>, vector<32x128xf32>, vector<8x128xf32> -> vector<8x128xf32>
    %287 = arith.addf %187, %286 : vector<8x128xf32>
    %288 = arith.negf %287 : vector<8x128xf32>
    %289 = math.exp %288 : vector<8x128xf32>
    %cst_57 = arith.constant 1.000000e+00 : f32
    %290 = vector.broadcast %cst_57 : f32 to vector<8x128xf32>
    %291 = arith.addf %290, %289 : vector<8x128xf32>
    %292 = arith.divf %290, %291 : vector<8x128xf32>
    %293 = vector.extract_strided_slice %292 {offsets = [0, 0], sizes = [8, 32], strides = [1, 1]} : vector<8x128xf32> to vector<8x32xf32>
    %294 = vector.extract_strided_slice %292 {offsets = [0, 32], sizes = [8, 32], strides = [1, 1]} : vector<8x128xf32> to vector<8x32xf32>
    %295 = vector.extract_strided_slice %292 {offsets = [0, 96], sizes = [8, 32], strides = [1, 1]} : vector<8x128xf32> to vector<8x32xf32>
    %296 = vector.extract_strided_slice %287 {offsets = [0, 64], sizes = [8, 32], strides = [1, 1]} : vector<8x128xf32> to vector<8x32xf32>
    %297 = math.tanh %296 : vector<8x32xf32>
    %298 = arith.mulf %294, %280 : vector<8x32xf32>
    %299 = arith.mulf %293, %297 : vector<8x32xf32>
    %300 = arith.addf %298, %299 : vector<8x32xf32>
    %301 = math.tanh %300 : vector<8x32xf32>
    %302 = arith.mulf %295, %301 : vector<8x32xf32>
    %cst_58 = arith.constant dense<0.000000e+00> : vector<8x128xf32>
    %303 = tpu.matmul %302, %2, %cst_58 {dimension_numbers = #tpu.dot_dimension_numbers<[1], [0], [0], [1], [0, 0, 1, 1], [], []>} : vector<8x32xf32>, vector<32x128xf32>, vector<8x128xf32> -> vector<8x128xf32>
    %304 = arith.addf %303, %190 : vector<8x128xf32>
    %c40 = arith.constant 40 : index
    %c0_59 = arith.constant 0 : index
    %305 = vector.load %arg10[%c40, %c0_59] : memref<64x128xf32, #tpu.memory_space<vmem>>, vector<8x128xf32>
    tpu.vector_store %arg10[%c40, %c0_59], %304 {strides = array<i32>} : memref<64x128xf32, #tpu.memory_space<vmem>>, vector<8x128xf32>,
    %cst_60 = arith.constant dense<0.000000e+00> : vector<8x128xf32>
    %306 = tpu.matmul %302, %1, %cst_60 {dimension_numbers = #tpu.dot_dimension_numbers<[1], [0], [0], [1], [0, 0, 1, 1], [], []>} : vector<8x32xf32>, vector<32x128xf32>, vector<8x128xf32> -> vector<8x128xf32>
    %307 = arith.addf %187, %306 : vector<8x128xf32>
    %308 = arith.negf %307 : vector<8x128xf32>
    %309 = math.exp %308 : vector<8x128xf32>
    %cst_61 = arith.constant 1.000000e+00 : f32
    %310 = vector.broadcast %cst_61 : f32 to vector<8x128xf32>
    %311 = arith.addf %310, %309 : vector<8x128xf32>
    %312 = arith.divf %310, %311 : vector<8x128xf32>
    %313 = vector.extract_strided_slice %312 {offsets = [0, 0], sizes = [8, 32], strides = [1, 1]} : vector<8x128xf32> to vector<8x32xf32>
    %314 = vector.extract_strided_slice %312 {offsets = [0, 32], sizes = [8, 32], strides = [1, 1]} : vector<8x128xf32> to vector<8x32xf32>
    %315 = vector.extract_strided_slice %312 {offsets = [0, 96], sizes = [8, 32], strides = [1, 1]} : vector<8x128xf32> to vector<8x32xf32>
    %316 = vector.extract_strided_slice %307 {offsets = [0, 64], sizes = [8, 32], strides = [1, 1]} : vector<8x128xf32> to vector<8x32xf32>
    %317 = math.tanh %316 : vector<8x32xf32>
    %318 = arith.mulf %314, %300 : vector<8x32xf32>
    %319 = arith.mulf %313, %317 : vector<8x32xf32>
    %320 = arith.addf %318, %319 : vector<8x32xf32>
    %321 = math.tanh %320 : vector<8x32xf32>
    %322 = arith.mulf %315, %321 : vector<8x32xf32>
    %cst_62 = arith.constant dense<0.000000e+00> : vector<8x128xf32>
    %323 = tpu.matmul %322, %2, %cst_62 {dimension_numbers = #tpu.dot_dimension_numbers<[1], [0], [0], [1], [0, 0, 1, 1], [], []>} : vector<8x32xf32>, vector<32x128xf32>, vector<8x128xf32> -> vector<8x128xf32>
    %324 = arith.addf %323, %190 : vector<8x128xf32>
    %c48 = arith.constant 48 : index
    %c0_63 = arith.constant 0 : index
    %325 = vector.load %arg10[%c48, %c0_63] : memref<64x128xf32, #tpu.memory_space<vmem>>, vector<8x128xf32>
    tpu.vector_store %arg10[%c48, %c0_63], %324 {strides = array<i32>} : memref<64x128xf32, #tpu.memory_space<vmem>>, vector<8x128xf32>,
    %cst_64 = arith.constant dense<0.000000e+00> : vector<8x128xf32>
    %326 = tpu.matmul %322, %1, %cst_64 {dimension_numbers = #tpu.dot_dimension_numbers<[1], [0], [0], [1], [0, 0, 1, 1], [], []>} : vector<8x32xf32>, vector<32x128xf32>, vector<8x128xf32> -> vector<8x128xf32>
    %327 = arith.addf %187, %326 : vector<8x128xf32>
    %328 = arith.negf %327 : vector<8x128xf32>
    %329 = math.exp %328 : vector<8x128xf32>
    %cst_65 = arith.constant 1.000000e+00 : f32
    %330 = vector.broadcast %cst_65 : f32 to vector<8x128xf32>
    %331 = arith.addf %330, %329 : vector<8x128xf32>
    %332 = arith.divf %330, %331 : vector<8x128xf32>
    %333 = vector.extract_strided_slice %332 {offsets = [0, 0], sizes = [8, 32], strides = [1, 1]} : vector<8x128xf32> to vector<8x32xf32>
    %334 = vector.extract_strided_slice %332 {offsets = [0, 32], sizes = [8, 32], strides = [1, 1]} : vector<8x128xf32> to vector<8x32xf32>
    %335 = vector.extract_strided_slice %332 {offsets = [0, 96], sizes = [8, 32], strides = [1, 1]} : vector<8x128xf32> to vector<8x32xf32>
    %336 = vector.extract_strided_slice %327 {offsets = [0, 64], sizes = [8, 32], strides = [1, 1]} : vector<8x128xf32> to vector<8x32xf32>
    %337 = math.tanh %336 : vector<8x32xf32>
    %338 = arith.mulf %334, %320 : vector<8x32xf32>
    %339 = arith.mulf %333, %337 : vector<8x32xf32>
    %340 = arith.addf %338, %339 : vector<8x32xf32>
    %341 = math.tanh %340 : vector<8x32xf32>
    %342 = arith.mulf %335, %341 : vector<8x32xf32>
    %cst_66 = arith.constant dense<0.000000e+00> : vector<8x128xf32>
    %343 = tpu.matmul %342, %2, %cst_66 {dimension_numbers = #tpu.dot_dimension_numbers<[1], [0], [0], [1], [0, 0, 1, 1], [], []>} : vector<8x32xf32>, vector<32x128xf32>, vector<8x128xf32> -> vector<8x128xf32>
    %344 = arith.addf %343, %190 : vector<8x128xf32>
    %c56 = arith.constant 56 : index
    %c0_67 = arith.constant 0 : index
    %345 = vector.load %arg10[%c56, %c0_67] : memref<64x128xf32, #tpu.memory_space<vmem>>, vector<8x128xf32>
    tpu.vector_store %arg10[%c56, %c0_67], %344 {strides = array<i32>} : memref<64x128xf32, #tpu.memory_space<vmem>>, vector<8x128xf32>,
    return
  }
  func.func @transform_0(%arg0: i32) -> (i32, i32) {
    %c0_i32 = arith.constant 0 : i32
    %c0_i32_0 = arith.constant 0 : i32
    %c0_i32_1 = arith.constant 0 : i32
    return %c0_i32, %c0_i32_0 : i32, i32
  }
  func.func @transform_1(%arg0: i32) -> (i32, i32) {
    %c0_i32 = arith.constant 0 : i32
    %c0_i32_0 = arith.constant 0 : i32
    %c0_i32_1 = arith.constant 0 : i32
    return %c0_i32, %c0_i32_0 : i32, i32
  }
  func.func @transform_2(%arg0: i32) -> (i32, i32) {
    %c0_i32 = arith.constant 0 : i32
    %c0_i32_0 = arith.constant 0 : i32
    %c0_i32_1 = arith.constant 0 : i32
    return %c0_i32, %c0_i32_0 : i32, i32
  }
  func.func @transform_3(%arg0: i32) -> (i32, i32) {
    %c0_i32 = arith.constant 0 : i32
    %c0_i32_0 = arith.constant 0 : i32
    %c0_i32_1 = arith.constant 0 : i32
    return %c0_i32, %c0_i32_0 : i32, i32
  }
  func.func @transform_4(%arg0: i32) -> (i32, i32) {
    %c0_i32 = arith.constant 0 : i32
    %c0_i32_0 = arith.constant 0 : i32
    %c0_i32_1 = arith.constant 0 : i32
    return %c0_i32, %c0_i32_0 : i32, i32
  }
  func.func @transform_5(%arg0: i32) -> (i32, i32) {
    %c0_i32 = arith.constant 0 : i32
    %c0_i32_0 = arith.constant 0 : i32
    %c0_i32_1 = arith.constant 0 : i32
    return %c0_i32, %c0_i32_0 : i32, i32
  }
  func.func @transform_6(%arg0: i32) -> (i32, i32) {
    %c0_i32 = arith.constant 0 : i32
    %c0_i32_0 = arith.constant 0 : i32
    %c0_i32_1 = arith.constant 0 : i32
    return %c0_i32, %c0_i32_0 : i32, i32
  }
  func.func @transform_7(%arg0: i32) -> (i32, i32) {
    %c0_i32 = arith.constant 0 : i32
    %c0_i32_0 = arith.constant 0 : i32
    %c0_i32_1 = arith.constant 0 : i32
    return %c0_i32, %c0_i32_0 : i32, i32
  }
  func.func @transform_8(%arg0: i32) -> (i32, i32) {
    %c0_i32 = arith.constant 0 : i32
    %c0_i32_0 = arith.constant 0 : i32
    %c0_i32_1 = arith.constant 0 : i32
    return %c0_i32, %c0_i32_0 : i32, i32
  }
  func.func @transform_9(%arg0: i32) -> (i32, i32) {
    %c0_i32 = arith.constant 0 : i32
    %c0_i32_0 = arith.constant 0 : i32
    %c0_i32_1 = arith.constant 0 : i32
    return %c0_i32, %c0_i32_0 : i32, i32
  }
}

</mosaic_0001>

<bundles_post_ra>
// kernel: lstm_autoencoder_forward.1
= control target key start
LH: loop header
LB: loop body
LE: loop exit
PB: predicated region body
PF: predicated region fallthrough
CT: control target
= control target key end

     0   :  { %vm104_vm0 = vcmask 1043456   ;;  %v2882_v1 = vmov 0.0   ;;  %vm79_vm1 = vcmask 31744   ;;  %v67_v11 = vlaneseq  ;;  %s3706_s1 = inlined_call_operand.vmem [shape: f32[4,256], index: 1, kind: input, shape index: {}]   ;;  %s3707_s0 = inlined_call_operand.vmem [shape: f32[64,4], index: 0, kind: input, shape index: {}]   ;;  %s3708_s2 = inlined_call_operand.vmem [shape: f32[1,256], index: 2, kind: input, shape index: {}]   ;;  %s3709_s3 = inlined_call_operand.vmem [shape: f32[64,256], index: 3, kind: input, shape index: {}]   ;;  %s3710_s4 = inlined_call_operand.vmem [shape: f32[64,128], index: 4, kind: input, shape index: {}]   ;;  %s3711_s5 = inlined_call_operand.vmem [shape: f32[1,128], index: 5, kind: input, shape index: {}]   ;;  %s3712_s7 = inlined_call_operand.vmem [shape: f32[32,128], index: 7, kind: input, shape index: {}]   ;;  %s3713_s6 = inlined_call_operand.vmem [shape: f32[32,128], index: 6, kind: input, shape index: {}]   ;;  %s3714_s8 = inlined_call_operand.vmem [shape: f32[1,128], index: 8, kind: input, shape index: {}]   ;;  %s3715_s9 = inlined_call_operand.vmem [shape: f32[64,128], index: 9, kind: output, shape index: {}]  }
   0x1   :  { %v64_v0 = vld [vmem:[%s3706_s1] sm:$0xff]  ;;  %173 = vmatprep.mubr.f32.mxu0 %v2882_v1  ;;  %345 = vmatprep.mubr.f32.mxu1 %v2882_v1  ;;  %v57_v4 = vld [vmem:[%s3707_s0 + $0x8] sm:$0xff]  ;;  %v58_v5 = vld [vmem:[%s3707_s0 + $0x10] sm:$0xff]  ;;  %vm278_vm4 = vcmask 523264   ;;  %vm2884_vm5 = vmmov 0   ;;  %vm1110_vm6 = vcmask 261120  }
   0x2   :  { %v78_v2 = vcombine.high %v64_v0, %v64_v0  ;;  %v56_v3 = vld [vmem:[%s3707_s0] sm:$0xff]  ;;  %v59_v6 = vld [vmem:[%s3707_s0 + $0x18] sm:$0xff]  ;;  %v61_v8 = vld [vmem:[%s3707_s0 + $0x28] sm:$0xff]  ;;  %v68_v12 = vshrl.u32 %v67_v11, 7  ;;  %v223_v23 = vand.u32 127, %v67_v11 }
   0x3   :  { %v60_v7 = vld [vmem:[%s3707_s0 + $0x20] sm:$0xff]  ;;  %v62_v9 = vld [vmem:[%s3707_s0 + $0x30] sm:$0xff]  ;;  %v63_v10 = vld [vmem:[%s3707_s0 + $0x38] sm:$0xff]  ;;  %s2883_s0 = smov 64  }
   0x4   :  { %2389 = vmatprep.subr.msk.mxu0 %vm104_vm0, %v78_v2  ;;  %v69_v13 = vsub.s32 0, %v68_v12  ;;  %v65_v14 = vld [vmem:[%s3708_s2] sm:$0x3]  ;;  %v73_v16 = vsub.s32 1, %v68_v12  ;;  %v224_v28 = vadd.s32 128, %v223_v23  ;;  %v229_v31 = vand.u32 63, %v223_v23 }
   0x5   :  { %2390 = vmatpush1.msk.msra.mxu0 %vm104_vm0, %v64_v0  ;;  %v3140_v23 = vld [vmem:[%s3709_s3 + $0x40] sm:$0xff]  ;;  %v998_v40 = vld [vmem:[%s3710_s4 + $0x30] sm:$0xff] }
   0x6   :  { %2391 = vmatmul.mubr.msk.f32.vlgmr.msra.gmra.mxu0 %vm79_vm1, %v56_v3  ;;  %v70_v18 = vrot.slane %v65_v14, %v69_v13  ;;  %v74_v20 = vrot.slane %v65_v14, %v73_v16  ;;  %v236_v34 = vand.u32 63, %v224_v28  ;;  %vm2997_vm2 = vcmp.lt.s32.totalorder %v229_v31, 32  ;;  %v3101_v16 = vld [vmem:[%s3709_s3 + $0x70] sm:$0xff]  ;;  %v3161_v28 = vld [vmem:[%s3709_s3 + $0x28] sm:$0xff]  ;;  %v3168_v31 = vld [vmem:[%s3709_s3 + $0x20] sm:$0xff] }
   0x7   :  { %179 = vmatprep.mubr.f32.mxu0 %v2882_v1 }
   0x8   :  { %vm3003_vm3 = vcmp.lt.s32.totalorder %v236_v34, 32  ;;  %v3182_v34 = vld [vmem:[%s3709_s3 + $0x10] sm:$0xff] }
   0xa   :  { %2392 = vmatmul.mubr.msk.f32.gmra.mxu0 %vm79_vm1, %v57_v4 }
   0xb   :  { %185 = vmatprep.mubr.f32.mxu0 %v2882_v1 }
   0xe   :  { %2393 = vmatmul.mubr.msk.f32.gmra.mxu0 %vm79_vm1, %v58_v5 }
   0xf   :  { %191 = vmatprep.mubr.f32.mxu0 %v2882_v1 }
  0x12   :  { %2394 = vmatmul.mubr.msk.f32.gmra.mxu0 %vm79_vm1, %v59_v6 }
  0x13   :  { %197 = vmatprep.mubr.f32.mxu0 %v2882_v1 }
  0x16   :  { %2395 = vmatmul.mubr.msk.f32.gmra.mxu0 %vm79_vm1, %v60_v7 }
  0x17   :  { %203 = vmatprep.mubr.f32.mxu0 %v2882_v1 }
  0x1a   :  { %2396 = vmatmul.mubr.msk.f32.gmra.mxu0 %vm79_vm1, %v61_v8 }
  0x1b   :  { %209 = vmatprep.mubr.f32.mxu0 %v2882_v1 }
  0x1e   :  { %2397 = vmatmul.mubr.msk.f32.gmra.mxu0 %vm79_vm1, %v62_v9 }
  0x1f   :  { %215 = vmatprep.mubr.f32.mxu0 %v2882_v1 }
  0x22   :  { %2398 = vmatmul.mubr.msk.f32.gmra.mxu0 %vm79_vm1, %v63_v10 }
  0x23   :  { %553 = vmatprep.mubr.f32.mxu0 %v2882_v1 }
  0xc6   :  { %v175_v15 = vpop.f32.mrf.mxu0 }
  0xc7   :  { %v3057_v61 = vadd.f32 %v175_v15, %v70_v18  ;;  %v3096_v15 = vld [vmem:[%s3709_s3 + $0x78] sm:$0xff] }
  0xc8   :  { %v177_v17 = vpop.f32.mrf.mxu0  ;;  %297 = vmatprep.subr.mxu1 %v3096_v15  ;;  %505 = vmatprep.subr.mxu0 %v3096_v15 }
  0xc9   :  { %v3069_v3 = vadd.f32 %v177_v17, %v74_v20  ;;  %v3106_v17 = vld [vmem:[%s3709_s3 + $0x68] sm:$0xff]  ;;  %298 = vmatpush1.msra.mxu1 %v3101_v16  ;;  %506 = vmatpush1.msra.mxu0 %v3101_v16 }
  0xca   :  { %v181_v19 = vpop.f32.mrf.mxu0  ;;  %299 = vmatprep.subr.mxu1 %v3106_v17  ;;  %507 = vmatprep.subr.mxu0 %v3106_v17 }
  0xcb   :  { %v2985_v21 = vadd.f32 %v181_v19, %v70_v18  ;;  %v3119_v19 = vld [vmem:[%s3709_s3 + $0x58] sm:$0xff] }
  0xcc   :  { %v183_v22 = vpop.f32.mrf.mxu0 }
  0xcd   :  { %v2987_v24 = vadd.f32 %v183_v22, %v74_v20  ;;  %v3133_v22 = vld [vmem:[%s3709_s3 + $0x48] sm:$0xff] }
  0xce   :  { %v187_v25 = vpop.f32.mrf.mxu0 }
  0xcf   :  { %v2989_v26 = vadd.f32 %v187_v25, %v70_v18  ;;  %v3147_v25 = vld [vmem:[%s3709_s3 + $0x38] sm:$0xff] }
  0xd0   :  { %v189_v27 = vpop.f32.mrf.mxu0 }
  0xd1   :  { %v2991_v29 = vadd.f32 %v189_v27, %v74_v20  ;;  %v3154_v27 = vld [vmem:[%s3709_s3 + $0x30] sm:$0xff] }
  0xd2   :  { %v193_v30 = vpop.f32.mrf.mxu0 }
  0xd3   :  { %v2993_v32 = vadd.f32 %v193_v30, %v70_v18 }
  0xd4   :  { %v195_v33 = vpop.f32.mrf.mxu0 }
  0xd5   :  { %v2995_v35 = vadd.f32 %v195_v33, %v74_v20  ;;  %v3176_v33 = vld [vmem:[%s3709_s3 + $0x18] sm:$0xff] }
  0xd6   :  { %v199_v36 = vpop.f32.mrf.mxu0 }
  0xd7   :  { %v3001_v38 = vadd.f32 %v199_v36, %v70_v18  ;;  %v3189_v36 = vld [vmem:[%s3709_s3 + $0x8] sm:$0xff] }
  0xd8   :  { %v201_v39 = vpop.f32.mrf.mxu0 }
  0xd9   :  { %v3007_v41 = vadd.f32 %v201_v39, %v74_v20  ;;  %v482_v42 = vsel %vm2997_vm2, %v2993_v32, %v3001_v38  ;;  %v584_v43 = vsel %vm2997_vm2, %v3001_v38, %v2993_v32  ;;  %v3196_v39 = vld [vmem:[%s3709_s3] sm:$0xff] }
  0xda   :  { %v205_v44 = vpop.f32.mrf.mxu0 }
  0xdb   :  { %v3017_v45 = vadd.f32 %v205_v44, %v70_v18  ;;  %v483_v46 = vsel %vm3003_vm3, %v2995_v35, %v3007_v41  ;;  %v585_v47 = vsel %vm3003_vm3, %v3007_v41, %v2995_v35 }
  0xdc   :  { %v207_v48 = vpop.f32.mrf.mxu0 }
  0xdd   :  { %v3027_v49 = vadd.f32 %v207_v48, %v74_v20  ;;  %v380_v50 = vsel %vm2997_vm2, %v2989_v26, %v3017_v45  ;;  %v686_v51 = vsel %vm2997_vm2, %v3017_v45, %v2989_v26 }
  0xde   :  { %v211_v52 = vpop.f32.mrf.mxu0 }
  0xdf   :  { %v3037_v53 = vadd.f32 %v211_v52, %v70_v18  ;;  %v381_v54 = vsel %vm3003_vm3, %v2991_v29, %v3027_v49  ;;  %v687_v55 = vsel %vm3003_vm3, %v3027_v49, %v2991_v29 }
  0xe0   :  { %v213_v56 = vpop.f32.mrf.mxu0 }
  0xe1   :  { %v3047_v57 = vadd.f32 %v213_v56, %v74_v20  ;;  %v273_v58 = vsel %vm2997_vm2, %v2985_v21, %v3037_v53  ;;  %v788_v59 = vsel %vm2997_vm2, %v3037_v53, %v2985_v21 }
  0xe2   :  { %v217_v60 = vpop.f32.mrf.mxu0 }
  0xe3   :  { %v3059_v62 = vadd.f32 %v217_v60, %v70_v18  ;;  %v274_v63 = vsel %vm3003_vm3, %v2987_v24, %v3047_v57  ;;  %v789_v0 = vsel %vm3003_vm3, %v3047_v57, %v2987_v24  ;;  %v3112_v18 = vld [vmem:[%s3709_s3 + $0x60] sm:$0xff] }
  0xe4   :  { %v219_v2 = vpop.f32.mrf.mxu0  ;;  %300 = vmatpush1.msra.mxu1 %v3112_v18  ;;  %508 = vmatpush1.msra.mxu0 %v3112_v18 }
  0xe5   :  { %v251_v4 = vsel %vm2997_vm2, %v3057_v61, %v3059_v62  ;;  %v3075_v5 = vadd.f32 %v219_v2, %v74_v20  ;;  %v890_v6 = vsel %vm2997_vm2, %v3059_v62, %v3057_v61  ;;  %v3126_v20 = vld [vmem:[%s3709_s3 + $0x50] sm:$0xff]  ;;  %301 = vmatprep.subr.mxu1 %v3119_v19  ;;  %509 = vmatprep.subr.mxu0 %v3119_v19  ;;  %v999_v61 = vld [vmem:[%s3710_s4 + $0x38] sm:$0xff]  ;;  %v997_v62 = vld [vmem:[%s3710_s4 + $0x28] sm:$0xff]  ;;  %s2885_s3 = smov 96  }
  0xe6   :  { %v2399_v7 = vmul.f32 -1.442695, %v251_v4  ;;  %302 = vmatpush1.msra.mxu1 %v3126_v20  ;;  %510 = vmatpush1.msra.mxu0 %v3126_v20 }
  0xe7   :  { %v891_v8 = vsel %vm3003_vm3, %v3075_v5, %v3069_v3  ;;  %v3089_v9 = vsel %vm3003_vm3, %v3069_v3, %v3075_v5  ;;  %303 = vmatprep.subr.mxu1 %v3133_v22  ;;  %511 = vmatprep.subr.mxu0 %v3133_v22  ;;  %v996_v3 = vld [vmem:[%s3710_s4 + $0x20] sm:$0xff]  ;;  %v995_v5 = vld [vmem:[%s3710_s4 + $0x18] sm:$0xff] }
  0xe8   :  { %2722 = vpow2.f32 %v2399_v7  ;;  %304 = vmatpush1.msra.mxu1 %v3140_v23  ;;  %512 = vmatpush1.msra.mxu0 %v3140_v23  ;;  %v2400_v44 = vmul.f32 -1.442695, %v3089_v9 }
  0xe9   :  { %2724 = vtanh.f32 %v3089_v9  ;;  %305 = vmatprep.subr.mxu1 %v3147_v25  ;;  %513 = vmatprep.subr.mxu0 %v3147_v25 }
  0xea   :  { %306 = vmatpush1.msra.mxu1 %v3154_v27  ;;  %514 = vmatpush1.msra.mxu0 %v3154_v27 }
  0xeb   :  { %307 = vmatprep.subr.mxu1 %v3161_v28  ;;  %515 = vmatprep.subr.mxu0 %v3161_v28 }
  0xec   :  { %308 = vmatpush1.msra.mxu1 %v3168_v31  ;;  %516 = vmatpush1.msra.mxu0 %v3168_v31 }
  0xed   :  { %309 = vmatprep.subr.mxu1 %v3176_v33  ;;  %517 = vmatprep.subr.mxu0 %v3176_v33 }
  0xee   :  { %310 = vmatpush1.msra.mxu1 %v3182_v34  ;;  %518 = vmatpush1.msra.mxu0 %v3182_v34 }
  0xef   :  { %311 = vmatprep.subr.mxu1 %v3189_v36  ;;  %519 = vmatprep.subr.mxu0 %v3189_v36 }
  0xf0   :  { %312 = vmatpush1.msra.mxu1 %v3196_v39  ;;  %520 = vmatpush1.msra.mxu0 %v3196_v39 }
  0xf1   :  { %403 = vmatprep.subr.mxu1 %v3096_v15  ;;  %709 = vmatprep.subr.mxu0 %v3096_v15 }
  0xf5   :  { %v2723_v10 = vpop.eup %2722 }
  0xf6   :  { %v259_v11 = vadd.f32 1.0, %v2723_v10  ;;  %v2725_v12 = vpop.eup %2724 }
  0xf8   :  { %2726 = vrcp.f32 %v259_v11 }
 0x105   :  { %v2727_v13 = vpop.eup %2726 }
 0x106   :  { %v266_v14 = vmul.f32 %v2727_v13, %v2725_v12 }
 0x108   :  { %368 = vrot.lane.b32.xlu1 %v266_v14, %s2883_s0  ;;  %2728 = vtanh.f32 %v266_v14 }
 0x109   :  { %2730 = vpow2.f32 %v2400_v44 }
 0x115   :  { %v2729_v30 = vpop.eup %2728 }
 0x116   :  { %269 = vrot.lane.b32.xlu0 %v2729_v30, %s2883_s0  ;;  %v2731_v48 = vpop.eup %2730 }
 0x117   :  { %v260_v52 = vadd.f32 1.0, %v2731_v48 }
 0x119   :  { %2732 = vrcp.f32 %v260_v52 }
 0x126   :  { %v2733_v56 = vpop.eup %2732 }
 0x188   :  { %v270_v60 = vpop.permute.xlu0 %269 }
 0x189   :  { %v272_v2 = vmul.f32 %v2733_v56, %v270_v60  ;;  %v369_v56 = vpop.permute.xlu1 %368 }
 0x18b   :  { %276 = vrot.lane.b32.xlu0 %v272_v2, %s2883_s0 }
 0x1fd   :  { %v277_v4 = vpop.permute.xlu0 %276 }
 0x1fe   :  { %2401 = vmatmul.mubr.msk.f32.vlgmr.msra.gmra.mxu1 %vm278_vm4, %v277_v4 }
 0x1ff   :  { %404 = vmatpush1.msra.mxu1 %v3101_v16  ;;  %451 = vmatprep.mubr.f32.mxu1 %v2882_v1 }
 0x200   :  { %405 = vmatprep.subr.mxu1 %v3106_v17 }
 0x201   :  { %406 = vmatpush1.msra.mxu1 %v3112_v18 }
 0x202   :  { %407 = vmatprep.subr.mxu1 %v3119_v19 }
 0x203   :  { %408 = vmatpush1.msra.mxu1 %v3126_v20 }
 0x204   :  { %409 = vmatprep.subr.mxu1 %v3133_v22 }
 0x205   :  { %410 = vmatpush1.msra.mxu1 %v3140_v23 }
 0x206   :  { %411 = vmatprep.subr.mxu1 %v3147_v25 }
 0x207   :  { %412 = vmatpush1.msra.mxu1 %v3154_v27 }
 0x208   :  { %413 = vmatprep.subr.mxu1 %v3161_v28 }
 0x209   :  { %414 = vmatpush1.msra.mxu1 %v3168_v31 }
 0x20a   :  { %415 = vmatprep.subr.mxu1 %v3176_v33 }
 0x20b   :  { %416 = vmatpush1.msra.mxu1 %v3182_v34 }
 0x20c   :  { %417 = vmatprep.subr.mxu1 %v3189_v36 }
 0x20d   :  { %418 = vmatpush1.msra.mxu1 %v3196_v39 }
 0x20e   :  { %607 = vmatprep.subr.mxu1 %v3096_v15 }
 0x2be   :  { %v347_v7 = vpop.f32.mrf.mxu1 }
 0x2bf   :  { %v352_v9 = vadd.f32 %v347_v7, %v273_v58 }
 0x2c0   :  { %v349_v11 = vpop.f32.mrf.mxu1 }
 0x2c1   :  { %v2402_v10 = vmul.f32 -1.442695, %v352_v9  ;;  %v353_v12 = vadd.f32 %v349_v11, %v274_v63 }
 0x2c3   :  { %2734 = vpow2.f32 %v2402_v10  ;;  %v2403_v52 = vmul.f32 -1.442695, %v353_v12 }
 0x2c4   :  { %2736 = vtanh.f32 %v353_v12 }
 0x2d0   :  { %v2735_v13 = vpop.eup %2734 }
 0x2d1   :  { %v360_v14 = vadd.f32 1.0, %v2735_v13  ;;  %v2737_v30 = vpop.eup %2736 }
 0x2d3   :  { %2738 = vrcp.f32 %v360_v14 }
 0x2d4   :  { %2740 = vpow2.f32 %v2403_v52 }
 0x2e0   :  { %v2739_v44 = vpop.eup %2738 }
 0x2e1   :  { %v372_v48 = vmul.f32 %v2739_v44, %v2737_v30  ;;  %v2741_v58 = vpop.eup %2740  ;;  %v371_v2 = vmul.f32 %v2739_v44, %v369_v56 }
 0x2e2   :  { %v361_v60 = vadd.f32 1.0, %v2741_v58 }
 0x2e3   :  { %374 = vrot.lane.b32.xlu1 %v372_v48, %s2883_s0 }
 0x2e4   :  { %2742 = vrcp.f32 %v361_v60 }
 0x2f1   :  { %v2743_v63 = vpop.eup %2742 }
 0x355   :  { %v375_v4 = vpop.permute.xlu1 %374 }
 0x356   :  { %v377_v7 = vadd.f32 %v375_v4, %v371_v2 }
 0x358   :  { %2744 = vtanh.f32 %v377_v7 }
 0x365   :  { %v2745_v9 = vpop.eup %2744 }
 0x366   :  { %v379_v10 = vmul.f32 %v2745_v9, %v2743_v63 }
 0x368   :  { %383 = vrot.lane.b32.xlu0 %v379_v10, %s2883_s0 }
 0x3da   :  { %v384_v11 = vpop.permute.xlu0 %383 }
 0x3db   :  { %2404 = vmatmul.mubr.msk.f32.vlgmr.msra.gmra.mxu1 %vm278_vm4, %v384_v11 }
 0x3dc   :  { %608 = vmatpush1.msra.mxu1 %v3101_v16  ;;  %655 = vmatprep.mubr.f32.mxu1 %v2882_v1 }
 0x3dd   :  { %609 = vmatprep.subr.mxu1 %v3106_v17 }
 0x3de   :  { %610 = vmatpush1.msra.mxu1 %v3112_v18 }
 0x3df   :  { %611 = vmatprep.subr.mxu1 %v3119_v19 }
 0x3e0   :  { %612 = vmatpush1.msra.mxu1 %v3126_v20 }
 0x3e1   :  { %613 = vmatprep.subr.mxu1 %v3133_v22 }
 0x3e2   :  { %614 = vmatpush1.msra.mxu1 %v3140_v23 }
 0x3e3   :  { %615 = vmatprep.subr.mxu1 %v3147_v25 }
 0x3e4   :  { %616 = vmatpush1.msra.mxu1 %v3154_v27 }
 0x3e5   :  { %617 = vmatprep.subr.mxu1 %v3161_v28 }
 0x3e6   :  { %618 = vmatpush1.msra.mxu1 %v3168_v31 }
 0x3e7   :  { %619 = vmatprep.subr.mxu1 %v3176_v33 }
 0x3e8   :  { %620 = vmatpush1.msra.mxu1 %v3182_v34 }
 0x3e9   :  { %621 = vmatprep.subr.mxu1 %v3189_v36 }
 0x3ea   :  { %622 = vmatpush1.msra.mxu1 %v3196_v39 }
 0x3eb   :  { %811 = vmatprep.subr.mxu1 %v3096_v15 }
 0x49b   :  { %v453_v12 = vpop.f32.mrf.mxu1 }
 0x49c   :  { %v458_v13 = vadd.f32 %v453_v12, %v380_v50 }
 0x49d   :  { %v455_v30 = vpop.f32.mrf.mxu1 }
 0x49e   :  { %v2405_v14 = vmul.f32 -1.442695, %v458_v13  ;;  %v459_v44 = vadd.f32 %v455_v30, %v381_v54 }
 0x4a0   :  { %2746 = vpow2.f32 %v2405_v14  ;;  %v2406_v2 = vmul.f32 -1.442695, %v459_v44 }
 0x4a1   :  { %2748 = vtanh.f32 %v459_v44 }
 0x4ad   :  { %v2747_v48 = vpop.eup %2746 }
 0x4ae   :  { %v466_v52 = vadd.f32 1.0, %v2747_v48  ;;  %v2749_v58 = vpop.eup %2748 }
 0x4b0   :  { %2750 = vrcp.f32 %v466_v52 }
 0x4b1   :  { %2752 = vpow2.f32 %v2406_v2 }
 0x4bd   :  { %v2751_v56 = vpop.eup %2750 }
 0x4be   :  { %v474_v60 = vmul.f32 %v2751_v56, %v2749_v58  ;;  %v2753_v50 = vpop.eup %2752  ;;  %v473_v63 = vmul.f32 %v2751_v56, %v377_v7 }
 0x4bf   :  { %v467_v4 = vadd.f32 1.0, %v2753_v50 }
 0x4c0   :  { %476 = vrot.lane.b32.xlu1 %v474_v60, %s2883_s0 }
 0x4c1   :  { %2754 = vrcp.f32 %v467_v4 }
 0x4ce   :  { %v2755_v11 = vpop.eup %2754 }
 0x532   :  { %v477_v9 = vpop.permute.xlu1 %476 }
 0x533   :  { %v479_v10 = vadd.f32 %v477_v9, %v473_v63 }
 0x535   :  { %2756 = vtanh.f32 %v479_v10 }
 0x542   :  { %v2757_v54 = vpop.eup %2756 }
 0x543   :  { %v481_v12 = vmul.f32 %v2757_v54, %v2755_v11 }
 0x545   :  { %485 = vrot.lane.b32.xlu0 %v481_v12, %s2883_s0 }
 0x5b7   :  { %v486_v13 = vpop.permute.xlu0 %485 }
 0x5b8   :  { %2407 = vmatmul.mubr.msk.f32.vlgmr.msra.gmra.mxu0 %vm278_vm4, %v486_v13 }
 0x5b9   :  { %710 = vmatpush1.msra.mxu0 %v3101_v16  ;;  %757 = vmatprep.mubr.f32.mxu0 %v2882_v1 }
 0x5ba   :  { %711 = vmatprep.subr.mxu0 %v3106_v17 }
 0x5bb   :  { %712 = vmatpush1.msra.mxu0 %v3112_v18 }
 0x5bc   :  { %713 = vmatprep.subr.mxu0 %v3119_v19 }
 0x5bd   :  { %714 = vmatpush1.msra.mxu0 %v3126_v20 }
 0x5be   :  { %715 = vmatprep.subr.mxu0 %v3133_v22 }
 0x5bf   :  { %716 = vmatpush1.msra.mxu0 %v3140_v23 }
 0x5c0   :  { %717 = vmatprep.subr.mxu0 %v3147_v25 }
 0x5c1   :  { %718 = vmatpush1.msra.mxu0 %v3154_v27 }
 0x5c2   :  { %719 = vmatprep.subr.mxu0 %v3161_v28 }
 0x5c3   :  { %720 = vmatpush1.msra.mxu0 %v3168_v31 }
 0x5c4   :  { %721 = vmatprep.subr.mxu0 %v3176_v33 }
 0x5c5   :  { %722 = vmatpush1.msra.mxu0 %v3182_v34 }
 0x5c6   :  { %723 = vmatprep.subr.mxu0 %v3189_v36 }
 0x5c7   :  { %724 = vmatpush1.msra.mxu0 %v3196_v39 }
 0x5c8   :  { %913 = vmatprep.subr.mxu0 %v3096_v15 }
 0x678   :  { %v555_v7 = vpop.f32.mrf.mxu0 }
 0x679   :  { %v560_v14 = vadd.f32 %v555_v7, %v482_v42 }
 0x67a   :  { %v557_v44 = vpop.f32.mrf.mxu0 }
 0x67b   :  { %v2408_v30 = vmul.f32 -1.442695, %v560_v14  ;;  %v561_v48 = vadd.f32 %v557_v44, %v483_v46 }
 0x67d   :  { %2758 = vpow2.f32 %v2408_v30  ;;  %v2409_v2 = vmul.f32 -1.442695, %v561_v48 }
 0x67e   :  { %2760 = vtanh.f32 %v561_v48 }
 0x68a   :  { %v2759_v52 = vpop.eup %2758 }
 0x68b   :  { %v568_v58 = vadd.f32 1.0, %v2759_v52  ;;  %v2761_v15 = vpop.eup %2760 }
 0x68d   :  { %2762 = vrcp.f32 %v568_v58 }
 0x68e   :  { %2764 = vpow2.f32 %v2409_v2 }
 0x69a   :  { %v2763_v56 = vpop.eup %2762 }
 0x69b   :  { %v576_v60 = vmul.f32 %v2763_v56, %v2761_v15  ;;  %v2765_v42 = vpop.eup %2764  ;;  %v575_v4 = vmul.f32 %v2763_v56, %v479_v10 }
 0x69c   :  { %v569_v50 = vadd.f32 1.0, %v2765_v42 }
 0x69d   :  { %578 = vrot.lane.b32.xlu1 %v576_v60, %s2883_s0 }
 0x69e   :  { %2766 = vrcp.f32 %v569_v50 }
 0x6ab   :  { %v2767_v11 = vpop.eup %2766 }
 0x70f   :  { %v579_v63 = vpop.permute.xlu1 %578 }
 0x710   :  { %v581_v9 = vadd.f32 %v579_v63, %v575_v4 }
 0x712   :  { %2768 = vtanh.f32 %v581_v9 }
 0x71f   :  { %v2769_v46 = vpop.eup %2768 }
 0x720   :  { %v583_v54 = vmul.f32 %v2769_v46, %v2767_v11 }
 0x722   :  { %587 = vrot.lane.b32.xlu0 %v583_v54, %s2883_s0 }
 0x794   :  { %v588_v12 = vpop.permute.xlu0 %587 }
 0x795   :  { %2410 = vmatmul.mubr.msk.f32.vlgmr.msra.gmra.mxu1 %vm278_vm4, %v588_v12 }
 0x796   :  { %812 = vmatpush1.msra.mxu1 %v3101_v16  ;;  %859 = vmatprep.mubr.f32.mxu1 %v2882_v1 }
 0x797   :  { %813 = vmatprep.subr.mxu1 %v3106_v17 }
 0x798   :  { %814 = vmatpush1.msra.mxu1 %v3112_v18 }
 0x799   :  { %815 = vmatprep.subr.mxu1 %v3119_v19 }
 0x79a   :  { %816 = vmatpush1.msra.mxu1 %v3126_v20 }
 0x79b   :  { %817 = vmatprep.subr.mxu1 %v3133_v22 }
 0x79c   :  { %818 = vmatpush1.msra.mxu1 %v3140_v23 }
 0x79d   :  { %819 = vmatprep.subr.mxu1 %v3147_v25 }
 0x79e   :  { %820 = vmatpush1.msra.mxu1 %v3154_v27 }
 0x79f   :  { %821 = vmatprep.subr.mxu1 %v3161_v28 }
 0x7a0   :  { %822 = vmatpush1.msra.mxu1 %v3168_v31 }
 0x7a1   :  { %823 = vmatprep.subr.mxu1 %v3176_v33 }
 0x7a2   :  { %824 = vmatpush1.msra.mxu1 %v3182_v34 }
 0x7a3   :  { %825 = vmatprep.subr.mxu1 %v3189_v36 }
 0x7a4   :  { %826 = vmatpush1.msra.mxu1 %v3196_v39 }
 0x7a5   :  { %2532 = vmatprep.subr.mxu1 %v2882_v1 }
 0x855   :  { %v657_v10 = vpop.f32.mrf.mxu1 }
 0x856   :  { %v662_v13 = vadd.f32 %v657_v10, %v584_v43 }
 0x857   :  { %v659_v14 = vpop.f32.mrf.mxu1 }
 0x858   :  { %v2411_v7 = vmul.f32 -1.442695, %v662_v13  ;;  %v663_v30 = vadd.f32 %v659_v14, %v585_v47 }
 0x85a   :  { %2770 = vpow2.f32 %v2411_v7  ;;  %v2412_v32 = vmul.f32 -1.442695, %v663_v30 }
 0x85b   :  { %2772 = vtanh.f32 %v663_v30 }
 0x867   :  { %v2771_v44 = vpop.eup %2770 }
 0x868   :  { %v670_v48 = vadd.f32 1.0, %v2771_v44  ;;  %v2773_v52 = vpop.eup %2772 }
 0x86a   :  { %2774 = vrcp.f32 %v670_v48 }
 0x86b   :  { %2776 = vpow2.f32 %v2412_v32 }
 0x877   :  { %v2775_v58 = vpop.eup %2774 }
 0x878   :  { %v678_v15 = vmul.f32 %v2775_v58, %v2773_v52  ;;  %v2777_v38 = vpop.eup %2776  ;;  %v677_v56 = vmul.f32 %v2775_v58, %v581_v9 }
 0x879   :  { %v671_v43 = vadd.f32 1.0, %v2777_v38 }
 0x87a   :  { %680 = vrot.lane.b32.xlu1 %v678_v15, %s2883_s0 }
 0x87b   :  { %2778 = vrcp.f32 %v671_v43 }
 0x888   :  { %v2779_v35 = vpop.eup %2778 }
 0x8ec   :  { %v681_v60 = vpop.permute.xlu1 %680 }
 0x8ed   :  { %v683_v2 = vadd.f32 %v681_v60, %v677_v56  ;;  %v992_v60 = vld [vmem:[%s3710_s4] sm:$0xff] }
 0x8ef   :  { %2780 = vtanh.f32 %v683_v2 }
 0x8fc   :  { %v2781_v41 = vpop.eup %2780 }
 0x8fd   :  { %v685_v47 = vmul.f32 %v2781_v41, %v2779_v35 }
 0x8ff   :  { %689 = vrot.lane.b32.xlu0 %v685_v47, %s2883_s0 }
 0x971   :  { %v690_v42 = vpop.permute.xlu0 %689 }
 0x972   :  { %2413 = vmatmul.mubr.msk.f32.vlgmr.msra.gmra.mxu0 %vm278_vm4, %v690_v42 }
 0x973   :  { %914 = vmatpush1.msra.mxu0 %v3101_v16  ;;  %961 = vmatprep.mubr.f32.mxu0 %v2882_v1 }
 0x974   :  { %915 = vmatprep.subr.mxu0 %v3106_v17 }
 0x975   :  { %916 = vmatpush1.msra.mxu0 %v3112_v18 }
 0x976   :  { %917 = vmatprep.subr.mxu0 %v3119_v19 }
 0x977   :  { %918 = vmatpush1.msra.mxu0 %v3126_v20 }
 0x978   :  { %919 = vmatprep.subr.mxu0 %v3133_v22 }
 0x979   :  { %920 = vmatpush1.msra.mxu0 %v3140_v23 }
 0x97a   :  { %921 = vmatprep.subr.mxu0 %v3147_v25 }
 0x97b   :  { %922 = vmatpush1.msra.mxu0 %v3154_v27 }
 0x97c   :  { %923 = vmatprep.subr.mxu0 %v3161_v28 }
 0x97d   :  { %924 = vmatpush1.msra.mxu0 %v3168_v31 }
 0x97e   :  { %925 = vmatprep.subr.mxu0 %v3176_v33 }
 0x97f   :  { %926 = vmatpush1.msra.mxu0 %v3182_v34 }
 0x980   :  { %927 = vmatprep.subr.mxu0 %v3189_v36 }
 0x981   :  { %928 = vmatpush1.msra.mxu0 %v3196_v39 }
 0x982   :  { %2551 = vmatprep.subr.mxu0 %v2882_v1 }
 0xa32   :  { %v759_v16 = vpop.f32.mrf.mxu0 }
 0xa33   :  { %v764_v17 = vadd.f32 %v759_v16, %v686_v51 }
 0xa34   :  { %v761_v19 = vpop.f32.mrf.mxu0 }
 0xa35   :  { %v2414_v18 = vmul.f32 -1.442695, %v764_v17  ;;  %v765_v20 = vadd.f32 %v761_v19, %v687_v55 }
 0xa37   :  { %2782 = vpow2.f32 %v2414_v18  ;;  %v2415_v26 = vmul.f32 -1.442695, %v765_v20 }
 0xa38   :  { %2784 = vtanh.f32 %v765_v20 }
 0xa44   :  { %v2783_v22 = vpop.eup %2782 }
 0xa45   :  { %v772_v23 = vadd.f32 1.0, %v2783_v22  ;;  %v2785_v25 = vpop.eup %2784  ;;  %v2422_v22 = vld [vmem:[%s3711_s5] ss:$0 sm:$0xff] }
 0xa47   :  { %2786 = vrcp.f32 %v772_v23 }
 0xa48   :  { %2788 = vpow2.f32 %v2415_v26 }
 0xa54   :  { %v2787_v27 = vpop.eup %2786 }
 0xa55   :  { %v780_v28 = vmul.f32 %v2787_v27, %v2785_v25  ;;  %v2789_v45 = vpop.eup %2788  ;;  %v779_v31 = vmul.f32 %v2787_v27, %v683_v2 }
 0xa56   :  { %v773_v51 = vadd.f32 1.0, %v2789_v45 }
 0xa57   :  { %782 = vrot.lane.b32.xlu1 %v780_v28, %s2883_s0 }
 0xa58   :  { %2790 = vrcp.f32 %v773_v51 }
 0xa65   :  { %v2791_v29 = vpop.eup %2790 }
 0xac9   :  { %v783_v33 = vpop.permute.xlu1 %782 }
 0xaca   :  { %v785_v34 = vadd.f32 %v783_v33, %v779_v31 }
 0xacc   :  { %2792 = vtanh.f32 %v785_v34 }
 0xad9   :  { %v2793_v49 = vpop.eup %2792 }
 0xada   :  { %v787_v55 = vmul.f32 %v2793_v49, %v2791_v29  ;;  %v3436_v29 = vld [vmem:[%s3712_s7 + $0x18] sm:$0xff]  ;;  %v3441_v49 = vld [vmem:[%s3712_s7 + $0x10] sm:$0xff] }
 0xadc   :  { %791 = vrot.lane.b32.xlu0 %v787_v55, %s2883_s0  ;;  %v3449_v55 = vld [vmem:[%s3712_s7 + $0x8] sm:$0xff] }
 0xb4e   :  { %v792_v36 = vpop.permute.xlu0 %791 }
 0xb4f   :  { %2416 = vmatmul.mubr.msk.f32.vlgmr.msra.gmra.mxu1 %vm278_vm4, %v792_v36  ;;  %v3458_v36 = vld [vmem:[%s3712_s7] sm:$0xff]  ;;  %s2886_s7 = smov 32  }
 0xb50   :  { %2548 = vmatprep.mubr.msk.f32.mxu1 %vm2884_vm5, %v2882_v1  ;;  %2533 = vmatpush3.msra.mxu1 %v999_v61 }
 0xb51   :  { %2534 = vmatprep.subr.mxu1 %v2882_v1 }
 0xb52   :  { %2535 = vmatpush3.msra.mxu1 %v998_v40 }
 0xb53   :  { %2536 = vmatprep.subr.mxu1 %v2882_v1 }
 0xb54   :  { %2537 = vmatpush3.msra.mxu1 %v997_v62 }
 0xb55   :  { %2538 = vmatprep.subr.mxu1 %v2882_v1 }
 0xb56   :  { %2539 = vmatpush3.msra.mxu1 %v996_v3 }
 0xb57   :  { %2540 = vmatprep.subr.mxu1 %v2882_v1 }
 0xb58   :  { %2541 = vmatpush3.msra.mxu1 %v995_v5 }
 0xb59   :  { %2542 = vmatprep.subr.mxu1 %v2882_v1 }
 0xc0f   :  { %v861_v39 = vpop.f32.mrf.mxu1 }
 0xc10   :  { %v866_v50 = vadd.f32 %v861_v39, %v788_v59 }
 0xc11   :  { %v863_v63 = vpop.f32.mrf.mxu1 }
 0xc12   :  { %v2417_v4 = vmul.f32 -1.442695, %v866_v50  ;;  %v867_v9 = vadd.f32 %v863_v63, %v789_v0  ;;  %v3474_v63 = vld [vmem:[%s3713_s6 + $0x18] sm:$0xff] }
 0xc14   :  { %2794 = vpow2.f32 %v2417_v4  ;;  %v2418_v21 = vmul.f32 -1.442695, %v867_v9 }
 0xc15   :  { %2796 = vtanh.f32 %v867_v9 }
 0xc21   :  { %v2795_v11 = vpop.eup %2794 }
 0xc22   :  { %v874_v46 = vadd.f32 1.0, %v2795_v11  ;;  %v2797_v54 = vpop.eup %2796  ;;  %v3480_v11 = vld [vmem:[%s3713_s6 + $0x10] sm:$0xff] }
 0xc24   :  { %2798 = vrcp.f32 %v874_v46  ;;  %v3489_v46 = vld [vmem:[%s3713_s6 + $0x8] sm:$0xff] }
 0xc25   :  { %2800 = vpow2.f32 %v2418_v21 }
 0xc31   :  { %v2799_v12 = vpop.eup %2798 }
 0xc32   :  { %v882_v10 = vmul.f32 %v2799_v12, %v2797_v54  ;;  %v2801_v53 = vpop.eup %2800  ;;  %v881_v13 = vmul.f32 %v2799_v12, %v785_v34  ;;  %v3496_v54 = vld [vmem:[%s3713_s6] sm:$0xff] }
 0xc33   :  { %v875_v59 = vadd.f32 1.0, %v2801_v53  ;;  %v3516_v12 = vld [vmem:[%s3714_s8] ss:$0 sm:$0xff] }
 0xc34   :  { %884 = vrot.lane.b32.xlu1 %v882_v10, %s2883_s0 }
 0xc35   :  { %2802 = vrcp.f32 %v875_v59 }
 0xc42   :  { %v2803_v24 = vpop.eup %2802 }
 0xca6   :  { %v885_v7 = vpop.permute.xlu1 %884 }
 0xca7   :  { %v887_v14 = vadd.f32 %v885_v7, %v881_v13 }
 0xca9   :  { %2804 = vtanh.f32 %v887_v14 }
 0xcb6   :  { %v2805_v57 = vpop.eup %2804 }
 0xcb7   :  { %v889_v0 = vmul.f32 %v2805_v57, %v2803_v24 }
 0xcb9   :  { %893 = vrot.lane.b32.xlu0 %v889_v0, %s2883_s0 }
 0xd2b   :  { %v894_v30 = vpop.permute.xlu0 %893 }
 0xd2c   :  { %2419 = vmatmul.mubr.msk.f32.vlgmr.msra.gmra.mxu0 %vm278_vm4, %v894_v30 }
 0xd2d   :  { %2559 = vmatprep.mubr.msk.f32.mxu0 %vm2884_vm5, %v2882_v1  ;;  %2552 = vmatpush3.msra.mxu0 %v3436_v29 }
 0xd2e   :  { %2553 = vmatprep.subr.mxu0 %v2882_v1 }
 0xd2f   :  { %2554 = vmatpush3.msra.mxu0 %v3441_v49 }
 0xd30   :  { %2555 = vmatprep.subr.mxu0 %v2882_v1 }
 0xd31   :  { %2556 = vmatpush3.msra.mxu0 %v3449_v55 }
 0xd32   :  { %2557 = vmatprep.subr.mxu0 %v2882_v1 }
 0xd33   :  { %2558 = vmatpush3.msra.mxu0 %v3458_v36 }
 0xd34   :  { %2562 = vmatprep.subr.mxu0 %v2882_v1 }
 0xdec   :  { %v963_v44 = vpop.f32.mrf.mxu0 }
 0xded   :  { %v968_v48 = vadd.f32 %v963_v44, %v890_v6  ;;  %v994_v6 = vld [vmem:[%s3710_s4 + $0x10] sm:$0xff] }
 0xdee   :  { %v965_v58 = vpop.f32.mrf.mxu0  ;;  %2543 = vmatpush3.msra.mxu1 %v994_v6 }
 0xdef   :  { %v2420_v52 = vmul.f32 -1.442695, %v968_v48  ;;  %v969_v15 = vadd.f32 %v965_v58, %v891_v8  ;;  %v993_v8 = vld [vmem:[%s3710_s4 + $0x8] sm:$0xff]  ;;  %2544 = vmatprep.subr.mxu1 %v2882_v1 }
 0xdf0   :  { %2545 = vmatpush3.msra.mxu1 %v993_v8 }
 0xdf1   :  { %2806 = vpow2.f32 %v2420_v52  ;;  %2546 = vmatprep.subr.mxu1 %v2882_v1  ;;  %v2421_v2 = vmul.f32 -1.442695, %v969_v15 }
 0xdf2   :  { %2808 = vtanh.f32 %v969_v15  ;;  %2547 = vmatpush3.msra.mxu1 %v992_v60 }
 0xdf3   :  { %2573 = vmatprep.subr.mxu1 %v2882_v1 }
 0xdfe   :  { %v2807_v32 = vpop.eup %2806 }
 0xdff   :  { %v976_v38 = vadd.f32 1.0, %v2807_v32  ;;  %v2809_v43 = vpop.eup %2808 }
 0xe01   :  { %2810 = vrcp.f32 %v976_v38 }
 0xe02   :  { %2812 = vpow2.f32 %v2421_v2 }
 0xe0e   :  { %v2811_v56 = vpop.eup %2810 }
 0xe0f   :  { %v984_v37 = vmul.f32 %v2811_v56, %v2809_v43  ;;  %v2813_v35 = vpop.eup %2812  ;;  %v983_v47 = vmul.f32 %v2811_v56, %v887_v14 }
 0xe10   :  { %v977_v41 = vadd.f32 1.0, %v2813_v35 }
 0xe11   :  { %986 = vrot.lane.b32.xlu1 %v984_v37, %s2883_s0 }
 0xe12   :  { %2814 = vrcp.f32 %v977_v41 }
 0xe1f   :  { %v2815_v17 = vpop.eup %2814 }
 0xe83   :  { %v987_v42 = vpop.permute.xlu1 %986 }
 0xe84   :  { %v989_v16 = vadd.f32 %v987_v42, %v983_v47 }
 0xe86   :  { %2816 = vtanh.f32 %v989_v16 }
 0xe93   :  { %v2817_v18 = vpop.eup %2816 }
 0xe94   :  { %v991_v19 = vmul.f32 %v2817_v18, %v2815_v17 }
 0xe96   :  { %1008 = vrot.lane.b32.xlu0 %v991_v19, %s2883_s0 }
 0xf08   :  { %v1009_v20 = vpop.permute.xlu0 %1008 }
 0xf09   :  { %2549 = vmatmul.mubr.msk.f32.vlgmr.msra.gmra.mxu1 %vm278_vm4, %v1009_v20 }
 0xf0a   :  { %2581 = vmatprep.mubr.msk.f32.mxu1 %vm2884_vm5, %v2882_v1  ;;  %2574 = vmatpush3.msra.mxu1 %v3436_v29 }
 0xf0b   :  { %2575 = vmatprep.subr.mxu1 %v2882_v1 }
 0xf0c   :  { %2576 = vmatpush3.msra.mxu1 %v3441_v49 }
 0xf0d   :  { %2577 = vmatprep.subr.mxu1 %v2882_v1 }
 0xf0e   :  { %2578 = vmatpush3.msra.mxu1 %v3449_v55 }
 0xf0f   :  { %2579 = vmatprep.subr.mxu1 %v2882_v1 }
 0xf10   :  { %2580 = vmatpush3.msra.mxu1 %v3458_v36 }
 0xf11   :  { %2595 = vmatprep.subr.mxu1 %v2882_v1 }
 0xfc9   :  { %v1078_v23 = vpop.f32.mrf.mxu1 }
 0xfca   :  { %v3428_v25 = vadd.f32 %v2422_v22, %v1078_v23 }
 0xfcb   :  { %v2550_v27 = vpop.f32.mrf.mxu1 }
 0xfcc   :  { %2818 = vtanh.f32 %v3428_v25  ;;  %v2425_v26 = vmul.f32 -1.442695, %v3428_v25 }
 0xfce   :  { %2820 = vpow2.f32 %v2425_v26 }
 0xfd9   :  { %v2819_v28 = vpop.eup %2818 }
 0xfda   :  { %1097 = vrot.lane.b32.xlu1 %v2819_v28, %s2883_s0 }
 0xfdb   :  { %v2821_v45 = vpop.eup %2820 }
 0xfdc   :  { %v1092_v51 = vadd.f32 1.0, %v2821_v45 }
 0xfde   :  { %2822 = vrcp.f32 %v1092_v51 }
 0xfeb   :  { %v2823_v31 = vpop.eup %2822 }
0x104c   :  { %v1098_v33 = vpop.permute.xlu1 %1097 }
0x104d   :  { %v1100_v34 = vmul.f32 %v2823_v31, %v1098_v33 }
0x104f   :  { %2824 = vtanh.f32 %v1100_v34 }
0x105c   :  { %v2825_v39 = vpop.eup %2824 }
0x105d   :  { %1103 = vrot.lane.b32.xlu0 %v2825_v39, %s2885_s3 }
0x10cf   :  { %v1104_v50 = vpop.permute.xlu0 %1103 }
0x10d0   :  { %v1106_v4 = vmul.f32 %v2823_v31, %v1104_v50 }
0x10d2   :  { %1108 = vrot.lane.b32.xlu1 %v1106_v4, %s2886_s7 }
0x10d6   :  { %1263 = vrot.lane.b32.xlu1 %v1100_v34, %s2886_s7 }
0x1144   :  { %v1109_v9 = vpop.permute.xlu1 %1108 }
0x1145   :  { %2560 = vmatmul.mubr.msk.f32.vlgmr.msra.gmra.mxu0 %vm1110_vm6, %v1109_v9 }
0x1146   :  { %2563 = vmatpush3.msra.mxu0 %v3474_v63  ;;  %2570 = vmatprep.mubr.msk.f32.mxu0 %vm2884_vm5, %v2882_v1 }
0x1147   :  { %2564 = vmatprep.subr.mxu0 %v2882_v1 }
0x1148   :  { %2565 = vmatpush3.msra.mxu0 %v3480_v11  ;;  %v1264_v52 = vpop.permute.xlu1 %1263 }
0x1149   :  { %2566 = vmatprep.subr.mxu0 %v2882_v1 }
0x114a   :  { %2567 = vmatpush3.msra.mxu0 %v3489_v46 }
0x114b   :  { %2568 = vmatprep.subr.mxu0 %v2882_v1 }
0x114c   :  { %2569 = vmatpush3.msra.mxu0 %v3496_v54 }
0x114d   :  { %2571 = vmatmul.mubr.msk.f32.vlgmr.msra.gmra.mxu0 %vm1110_vm6, %v1109_v9  ;;  %2584 = vmatprep.subr.mxu0 %v2882_v1 }
0x114e   :  { %2585 = vmatpush3.msra.mxu0 %v3474_v63  ;;  %2592 = vmatprep.mubr.msk.f32.mxu0 %vm2884_vm5, %v2882_v1 }
0x114f   :  { %2586 = vmatprep.subr.mxu0 %v2882_v1 }
0x1150   :  { %2587 = vmatpush3.msra.mxu0 %v3480_v11 }
0x1151   :  { %2588 = vmatprep.subr.mxu0 %v2882_v1 }
0x1152   :  { %2589 = vmatpush3.msra.mxu0 %v3489_v46 }
0x1153   :  { %2590 = vmatprep.subr.mxu0 %v2882_v1 }
0x1154   :  { %2591 = vmatpush3.msra.mxu0 %v3496_v54 }
0x1155   :  { %2606 = vmatprep.subr.mxu0 %v2882_v1 }
0x1205   :  { %v1179_v10 = vpop.f32.mrf.mxu0 }
0x1206   :  { %v1180_v21 = vadd.f32 %v3516_v12, %v1179_v10 }
0x1207   :  { %v2561_v53 = vpop.f32.mrf.mxu0 }
0x1208   :  { %1183 = vst [vmem:[%s3715_s9] sm:$0xff] %v1180_v21 }
0x120d   :  { %v1250_v59 = vpop.f32.mrf.mxu0 }
0x120e   :  { %v1254_v13 = vadd.f32 %v1250_v59, %v3428_v25 }
0x120f   :  { %v2572_v7 = vpop.f32.mrf.mxu0 }
0x1210   :  { %2826 = vtanh.f32 %v1254_v13  ;;  %v2428_v24 = vmul.f32 -1.442695, %v1254_v13 }
0x1212   :  { %2828 = vpow2.f32 %v2428_v24 }
0x121d   :  { %v2827_v14 = vpop.eup %2826 }
0x121e   :  { %1268 = vrot.lane.b32.xlu0 %v2827_v14, %s2883_s0 }
0x121f   :  { %v2829_v57 = vpop.eup %2828 }
0x1220   :  { %v1258_v0 = vadd.f32 1.0, %v2829_v57 }
0x1222   :  { %2830 = vrcp.f32 %v1258_v0 }
0x122f   :  { %v2831_v30 = vpop.eup %2830 }
0x1230   :  { %v1266_v58 = vmul.f32 %v2831_v30, %v1264_v52 }
0x1290   :  { %v1269_v44 = vpop.permute.xlu0 %1268 }
0x1291   :  { %v1271_v48 = vmul.f32 %v2831_v30, %v1269_v44 }
0x1293   :  { %1273 = vrot.lane.b32.xlu0 %v1271_v48, %s2886_s7 }
0x1305   :  { %v1274_v15 = vpop.permute.xlu0 %1273 }
0x1306   :  { %v1276_v32 = vadd.f32 %v1274_v15, %v1266_v58 }
0x1308   :  { %2832 = vtanh.f32 %v1276_v32 }
0x1315   :  { %v2833_v38 = vpop.eup %2832 }
0x1316   :  { %1279 = vrot.lane.b32.xlu1 %v2833_v38, %s2883_s0 }
0x1388   :  { %v1280_v43 = vpop.permute.xlu1 %1279 }
0x1389   :  { %v1282_v56 = vmul.f32 %v2831_v30, %v1280_v43 }
0x138b   :  { %1284 = vrot.lane.b32.xlu0 %v1282_v56, %s2886_s7 }
0x13fd   :  { %v1285_v37 = vpop.permute.xlu0 %1284 }
0x13fe   :  { %2582 = vmatmul.mubr.msk.f32.vlgmr.msra.gmra.mxu1 %vm1110_vm6, %v1285_v37  ;;  %2593 = vmatmul.mubr.msk.f32.vlgmr.msra.gmra.mxu0 %vm1110_vm6, %v1285_v37 }
0x13ff   :  { %2596 = vmatpush3.msra.mxu1 %v3436_v29  ;;  %2607 = vmatpush3.msra.mxu0 %v3474_v63 }
0x1400   :  { %2597 = vmatprep.subr.mxu1 %v2882_v1  ;;  %2608 = vmatprep.subr.mxu0 %v2882_v1 }
0x1401   :  { %2598 = vmatpush3.msra.mxu1 %v3441_v49  ;;  %2609 = vmatpush3.msra.mxu0 %v3480_v11 }
0x1402   :  { %2599 = vmatprep.subr.mxu1 %v2882_v1  ;;  %2610 = vmatprep.subr.mxu0 %v2882_v1 }
0x1403   :  { %2600 = vmatpush3.msra.mxu1 %v3449_v55  ;;  %2611 = vmatpush3.msra.mxu0 %v3489_v46 }
0x1404   :  { %2601 = vmatprep.subr.mxu1 %v2882_v1  ;;  %2612 = vmatprep.subr.mxu0 %v2882_v1 }
0x1405   :  { %2613 = vmatpush3.msra.mxu0 %v3496_v54  ;;  %2614 = vmatprep.mubr.msk.f32.mxu0 %vm2884_vm5, %v2882_v1 }
0x1406   :  { %2602 = vmatpush3.msra.mxu1 %v3458_v36  ;;  %2603 = vmatprep.mubr.msk.f32.mxu1 %vm2884_vm5, %v2882_v1 }
0x1407   :  { %2617 = vmatprep.subr.mxu1 %v2882_v1  ;;  %2628 = vmatprep.subr.mxu0 %v2882_v1 }
0x14be   :  { %v1354_v61 = vpop.f32.mrf.mxu1  ;;  %v1425_v40 = vpop.f32.mrf.mxu0 }
0x14bf   :  { %v1355_v62 = vadd.f32 %v3516_v12, %v1354_v61  ;;  %v1429_v3 = vadd.f32 %v1425_v40, %v3428_v25 }
0x14c0   :  { %v2583_v5 = vpop.f32.mrf.mxu1  ;;  %v2594_v6 = vpop.f32.mrf.mxu0 }
0x14c1   :  { %1358 = vst [vmem:[%s3715_s9 + $0x8] sm:$0xff] %v1355_v62  ;;  %2834 = vtanh.f32 %v1429_v3  ;;  %v2431_v60 = vmul.f32 -1.442695, %v1429_v3 }
0x14c3   :  { %2836 = vpow2.f32 %v2431_v60 }
0x14ce   :  { %v2835_v8 = vpop.eup %2834 }
0x14cf   :  { %1439 = vrot.lane.b32.xlu1 %v2835_v8, %s2883_s0 }
0x14d0   :  { %v2837_v2 = vpop.eup %2836 }
0x14d1   :  { %v1433_v35 = vadd.f32 1.0, %v2837_v2 }
0x14d3   :  { %2838 = vrcp.f32 %v1433_v35 }
0x14e0   :  { %v2839_v41 = vpop.eup %2838 }
0x14e1   :  { %v1437_v16 = vmul.f32 %v2839_v41, %v1276_v32 }
0x1541   :  { %v1440_v47 = vpop.permute.xlu1 %1439 }
0x1542   :  { %v1442_v42 = vmul.f32 %v2839_v41, %v1440_v47 }
0x1544   :  { %1444 = vrot.lane.b32.xlu0 %v1442_v42, %s2886_s7 }
0x15b6   :  { %v1445_v17 = vpop.permute.xlu0 %1444 }
0x15b7   :  { %v1447_v18 = vadd.f32 %v1445_v17, %v1437_v16 }
0x15b9   :  { %2840 = vtanh.f32 %v1447_v18 }
0x15c6   :  { %v2841_v19 = vpop.eup %2840 }
0x15c7   :  { %1450 = vrot.lane.b32.xlu1 %v2841_v19, %s2883_s0 }
0x1639   :  { %v1451_v20 = vpop.permute.xlu1 %1450 }
0x163a   :  { %v1453_v22 = vmul.f32 %v2839_v41, %v1451_v20 }
0x163c   :  { %1455 = vrot.lane.b32.xlu0 %v1453_v22, %s2886_s7 }
0x16ae   :  { %v1456_v23 = vpop.permute.xlu0 %1455 }
0x16af   :  { %2604 = vmatmul.mubr.msk.f32.vlgmr.msra.gmra.mxu1 %vm1110_vm6, %v1456_v23  ;;  %2615 = vmatmul.mubr.msk.f32.vlgmr.msra.gmra.mxu0 %vm1110_vm6, %v1456_v23 }
0x16b0   :  { %2618 = vmatpush3.msra.mxu1 %v3436_v29  ;;  %2629 = vmatpush3.msra.mxu0 %v3474_v63 }
0x16b1   :  { %2619 = vmatprep.subr.mxu1 %v2882_v1  ;;  %2630 = vmatprep.subr.mxu0 %v2882_v1 }
0x16b2   :  { %2620 = vmatpush3.msra.mxu1 %v3441_v49  ;;  %2631 = vmatpush3.msra.mxu0 %v3480_v11 }
0x16b3   :  { %2621 = vmatprep.subr.mxu1 %v2882_v1  ;;  %2632 = vmatprep.subr.mxu0 %v2882_v1 }
0x16b4   :  { %2622 = vmatpush3.msra.mxu1 %v3449_v55  ;;  %2633 = vmatpush3.msra.mxu0 %v3489_v46 }
0x16b5   :  { %2623 = vmatprep.subr.mxu1 %v2882_v1  ;;  %2634 = vmatprep.subr.mxu0 %v2882_v1 }
0x16b6   :  { %2635 = vmatpush3.msra.mxu0 %v3496_v54  ;;  %2636 = vmatprep.mubr.msk.f32.mxu0 %vm2884_vm5, %v2882_v1 }
0x16b7   :  { %2624 = vmatpush3.msra.mxu1 %v3458_v36  ;;  %2625 = vmatprep.mubr.msk.f32.mxu1 %vm2884_vm5, %v2882_v1 }
0x16b8   :  { %2639 = vmatprep.subr.mxu1 %v2882_v1  ;;  %2650 = vmatprep.subr.mxu0 %v2882_v1 }
0x176f   :  { %v1525_v27 = vpop.f32.mrf.mxu1  ;;  %v1596_v28 = vpop.f32.mrf.mxu0 }
0x1770   :  { %v1526_v26 = vadd.f32 %v3516_v12, %v1525_v27  ;;  %v1600_v45 = vadd.f32 %v1596_v28, %v3428_v25 }
0x1771   :  { %v2605_v51 = vpop.f32.mrf.mxu1  ;;  %v2616_v31 = vpop.f32.mrf.mxu0 }
0x1772   :  { %1529 = vst [vmem:[%s3715_s9 + $0x10] sm:$0xff] %v1526_v26  ;;  %2842 = vtanh.f32 %v1600_v45  ;;  %v2434_v34 = vmul.f32 -1.442695, %v1600_v45 }
0x1774   :  { %2844 = vpow2.f32 %v2434_v34 }
0x177f   :  { %v2843_v33 = vpop.eup %2842 }
0x1780   :  { %1610 = vrot.lane.b32.xlu1 %v2843_v33, %s2883_s0 }
0x1781   :  { %v2845_v39 = vpop.eup %2844 }
0x1782   :  { %v1604_v50 = vadd.f32 1.0, %v2845_v39 }
0x1784   :  { %2846 = vrcp.f32 %v1604_v50 }
0x1791   :  { %v2847_v4 = vpop.eup %2846 }
0x1792   :  { %v1608_v21 = vmul.f32 %v2847_v4, %v1447_v18 }
0x17f2   :  { %v1611_v9 = vpop.permute.xlu1 %1610 }
0x17f3   :  { %v1613_v10 = vmul.f32 %v2847_v4, %v1611_v9 }
0x17f5   :  { %1615 = vrot.lane.b32.xlu0 %v1613_v10, %s2886_s7 }
0x1867   :  { %v1616_v53 = vpop.permute.xlu0 %1615 }
0x1868   :  { %v1618_v59 = vadd.f32 %v1616_v53, %v1608_v21 }
0x186a   :  { %2848 = vtanh.f32 %v1618_v59 }
0x1877   :  { %v2849_v13 = vpop.eup %2848 }
0x1878   :  { %1621 = vrot.lane.b32.xlu1 %v2849_v13, %s2883_s0 }
0x18ea   :  { %v1622_v7 = vpop.permute.xlu1 %1621 }
0x18eb   :  { %v1624_v14 = vmul.f32 %v2847_v4, %v1622_v7 }
0x18ed   :  { %1626 = vrot.lane.b32.xlu0 %v1624_v14, %s2886_s7 }
0x195f   :  { %v1627_v24 = vpop.permute.xlu0 %1626 }
0x1960   :  { %2626 = vmatmul.mubr.msk.f32.vlgmr.msra.gmra.mxu1 %vm1110_vm6, %v1627_v24  ;;  %2637 = vmatmul.mubr.msk.f32.vlgmr.msra.gmra.mxu0 %vm1110_vm6, %v1627_v24 }
0x1961   :  { %2640 = vmatpush3.msra.mxu1 %v3436_v29  ;;  %2651 = vmatpush3.msra.mxu0 %v3474_v63 }
0x1962   :  { %2641 = vmatprep.subr.mxu1 %v2882_v1  ;;  %2652 = vmatprep.subr.mxu0 %v2882_v1 }
0x1963   :  { %2642 = vmatpush3.msra.mxu1 %v3441_v49  ;;  %2653 = vmatpush3.msra.mxu0 %v3480_v11 }
0x1964   :  { %2643 = vmatprep.subr.mxu1 %v2882_v1  ;;  %2654 = vmatprep.subr.mxu0 %v2882_v1 }
0x1965   :  { %2644 = vmatpush3.msra.mxu1 %v3449_v55  ;;  %2655 = vmatpush3.msra.mxu0 %v3489_v46 }
0x1966   :  { %2645 = vmatprep.subr.mxu1 %v2882_v1  ;;  %2656 = vmatprep.subr.mxu0 %v2882_v1 }
0x1967   :  { %2657 = vmatpush3.msra.mxu0 %v3496_v54  ;;  %2658 = vmatprep.mubr.msk.f32.mxu0 %vm2884_vm5, %v2882_v1 }
0x1968   :  { %2646 = vmatpush3.msra.mxu1 %v3458_v36  ;;  %2647 = vmatprep.mubr.msk.f32.mxu1 %vm2884_vm5, %v2882_v1 }
0x1969   :  { %2661 = vmatprep.subr.mxu1 %v2882_v1  ;;  %2672 = vmatprep.subr.mxu0 %v2882_v1 }
0x1a20   :  { %v1696_v57 = vpop.f32.mrf.mxu1  ;;  %v1767_v0 = vpop.f32.mrf.mxu0 }
0x1a21   :  { %v1697_v30 = vadd.f32 %v3516_v12, %v1696_v57  ;;  %v1771_v44 = vadd.f32 %v1767_v0, %v3428_v25 }
0x1a22   :  { %v2627_v48 = vpop.f32.mrf.mxu1  ;;  %v2638_v52 = vpop.f32.mrf.mxu0 }
0x1a23   :  { %1700 = vst [vmem:[%s3715_s9 + $0x18] sm:$0xff] %v1697_v30  ;;  %2850 = vtanh.f32 %v1771_v44  ;;  %v2437_v15 = vmul.f32 -1.442695, %v1771_v44 }
0x1a25   :  { %2852 = vpow2.f32 %v2437_v15 }
0x1a30   :  { %v2851_v58 = vpop.eup %2850 }
0x1a31   :  { %1781 = vrot.lane.b32.xlu1 %v2851_v58, %s2883_s0 }
0x1a32   :  { %v2853_v32 = vpop.eup %2852 }
0x1a33   :  { %v1775_v38 = vadd.f32 1.0, %v2853_v32 }
0x1a35   :  { %2854 = vrcp.f32 %v1775_v38 }
0x1a42   :  { %v2855_v43 = vpop.eup %2854 }
0x1a43   :  { %v1779_v61 = vmul.f32 %v2855_v43, %v1618_v59 }
0x1aa3   :  { %v1782_v56 = vpop.permute.xlu1 %1781 }
0x1aa4   :  { %v1784_v37 = vmul.f32 %v2855_v43, %v1782_v56 }
0x1aa6   :  { %1786 = vrot.lane.b32.xlu0 %v1784_v37, %s2886_s7 }
0x1b18   :  { %v1787_v40 = vpop.permute.xlu0 %1786 }
0x1b19   :  { %v1789_v62 = vadd.f32 %v1787_v40, %v1779_v61 }
0x1b1b   :  { %2856 = vtanh.f32 %v1789_v62 }
0x1b28   :  { %v2857_v3 = vpop.eup %2856 }
0x1b29   :  { %1792 = vrot.lane.b32.xlu1 %v2857_v3, %s2883_s0 }
0x1b9b   :  { %v1793_v5 = vpop.permute.xlu1 %1792 }
0x1b9c   :  { %v1795_v6 = vmul.f32 %v2855_v43, %v1793_v5 }
0x1b9e   :  { %1797 = vrot.lane.b32.xlu0 %v1795_v6, %s2886_s7 }
0x1c10   :  { %v1798_v8 = vpop.permute.xlu0 %1797 }
0x1c11   :  { %2648 = vmatmul.mubr.msk.f32.vlgmr.msra.gmra.mxu1 %vm1110_vm6, %v1798_v8  ;;  %2659 = vmatmul.mubr.msk.f32.vlgmr.msra.gmra.mxu0 %vm1110_vm6, %v1798_v8 }
0x1c12   :  { %2662 = vmatpush3.msra.mxu1 %v3436_v29  ;;  %2673 = vmatpush3.msra.mxu0 %v3474_v63 }
0x1c13   :  { %2663 = vmatprep.subr.mxu1 %v2882_v1  ;;  %2674 = vmatprep.subr.mxu0 %v2882_v1 }
0x1c14   :  { %2664 = vmatpush3.msra.mxu1 %v3441_v49  ;;  %2675 = vmatpush3.msra.mxu0 %v3480_v11 }
0x1c15   :  { %2665 = vmatprep.subr.mxu1 %v2882_v1  ;;  %2676 = vmatprep.subr.mxu0 %v2882_v1 }
0x1c16   :  { %2666 = vmatpush3.msra.mxu1 %v3449_v55  ;;  %2677 = vmatpush3.msra.mxu0 %v3489_v46 }
0x1c17   :  { %2667 = vmatprep.subr.mxu1 %v2882_v1  ;;  %2678 = vmatprep.subr.mxu0 %v2882_v1 }
0x1c18   :  { %2679 = vmatpush3.msra.mxu0 %v3496_v54  ;;  %2680 = vmatprep.mubr.msk.f32.mxu0 %vm2884_vm5, %v2882_v1 }
0x1c19   :  { %2668 = vmatpush3.msra.mxu1 %v3458_v36  ;;  %2669 = vmatprep.mubr.msk.f32.mxu1 %vm2884_vm5, %v2882_v1 }
0x1c1a   :  { %2683 = vmatprep.subr.mxu1 %v2882_v1  ;;  %2694 = vmatprep.subr.mxu0 %v2882_v1 }
0x1cd1   :  { %v1867_v60 = vpop.f32.mrf.mxu1  ;;  %v1938_v2 = vpop.f32.mrf.mxu0 }
0x1cd2   :  { %v1868_v35 = vadd.f32 %v3516_v12, %v1867_v60  ;;  %v1942_v41 = vadd.f32 %v1938_v2, %v3428_v25 }
0x1cd3   :  { %v2649_v47 = vpop.f32.mrf.mxu1  ;;  %v2660_v42 = vpop.f32.mrf.mxu0 }
0x1cd4   :  { %1871 = vst [vmem:[%s3715_s9 + $0x20] sm:$0xff] %v1868_v35  ;;  %2858 = vtanh.f32 %v1942_v41  ;;  %v2440_v17 = vmul.f32 -1.442695, %v1942_v41 }
0x1cd6   :  { %2860 = vpow2.f32 %v2440_v17 }
0x1ce1   :  { %v2859_v16 = vpop.eup %2858 }
0x1ce2   :  { %1952 = vrot.lane.b32.xlu1 %v2859_v16, %s2883_s0 }
0x1ce3   :  { %v2861_v18 = vpop.eup %2860 }
0x1ce4   :  { %v1946_v19 = vadd.f32 1.0, %v2861_v18 }
0x1ce6   :  { %2862 = vrcp.f32 %v1946_v19 }
0x1cf3   :  { %v2863_v20 = vpop.eup %2862 }
0x1cf4   :  { %v1950_v27 = vmul.f32 %v2863_v20, %v1789_v62 }
0x1d54   :  { %v1953_v22 = vpop.permute.xlu1 %1952 }
0x1d55   :  { %v1955_v23 = vmul.f32 %v2863_v20, %v1953_v22 }
0x1d57   :  { %1957 = vrot.lane.b32.xlu0 %v1955_v23, %s2886_s7 }
0x1dc9   :  { %v1958_v28 = vpop.permute.xlu0 %1957 }
0x1dca   :  { %v1960_v26 = vadd.f32 %v1958_v28, %v1950_v27 }
0x1dcc   :  { %2864 = vtanh.f32 %v1960_v26 }
0x1dd9   :  { %v2865_v45 = vpop.eup %2864 }
0x1dda   :  { %1963 = vrot.lane.b32.xlu1 %v2865_v45, %s2883_s0 }
0x1e4c   :  { %v1964_v51 = vpop.permute.xlu1 %1963 }
0x1e4d   :  { %v1966_v31 = vmul.f32 %v2863_v20, %v1964_v51 }
0x1e4f   :  { %1968 = vrot.lane.b32.xlu0 %v1966_v31, %s2886_s7 }
0x1ec1   :  { %v1969_v33 = vpop.permute.xlu0 %1968 }
0x1ec2   :  { %2670 = vmatmul.mubr.msk.f32.vlgmr.msra.gmra.mxu1 %vm1110_vm6, %v1969_v33  ;;  %2681 = vmatmul.mubr.msk.f32.vlgmr.msra.gmra.mxu0 %vm1110_vm6, %v1969_v33 }
0x1ec3   :  { %2684 = vmatpush3.msra.mxu1 %v3436_v29  ;;  %2695 = vmatpush3.msra.mxu0 %v3474_v63 }
0x1ec4   :  { %2685 = vmatprep.subr.mxu1 %v2882_v1  ;;  %2696 = vmatprep.subr.mxu0 %v2882_v1 }
0x1ec5   :  { %2686 = vmatpush3.msra.mxu1 %v3441_v49  ;;  %2697 = vmatpush3.msra.mxu0 %v3480_v11 }
0x1ec6   :  { %2687 = vmatprep.subr.mxu1 %v2882_v1  ;;  %2698 = vmatprep.subr.mxu0 %v2882_v1 }
0x1ec7   :  { %2688 = vmatpush3.msra.mxu1 %v3449_v55  ;;  %2699 = vmatpush3.msra.mxu0 %v3489_v46 }
0x1ec8   :  { %2689 = vmatprep.subr.mxu1 %v2882_v1  ;;  %2700 = vmatprep.subr.mxu0 %v2882_v1 }
0x1ec9   :  { %2701 = vmatpush3.msra.mxu0 %v3496_v54  ;;  %2702 = vmatprep.mubr.msk.f32.mxu0 %vm2884_vm5, %v2882_v1 }
0x1eca   :  { %2690 = vmatpush3.msra.mxu1 %v3458_v36  ;;  %2691 = vmatprep.mubr.msk.f32.mxu1 %vm2884_vm5, %v2882_v1 }
0x1ecb   :  { %2705 = vmatprep.subr.mxu1 %v2882_v1 }
0x1f82   :  { %v2038_v63 = vpop.f32.mrf.mxu1  ;;  %v2109_v11 = vpop.f32.mrf.mxu0 }
0x1f83   :  { %v2039_v46 = vadd.f32 %v3516_v12, %v2038_v63  ;;  %v2113_v34 = vadd.f32 %v2109_v11, %v3428_v25 }
0x1f84   :  { %v2671_v39 = vpop.f32.mrf.mxu1  ;;  %v2682_v50 = vpop.f32.mrf.mxu0 }
0x1f85   :  { %2042 = vst [vmem:[%s3715_s9 + $0x28] sm:$0xff] %v2039_v46  ;;  %2866 = vtanh.f32 %v2113_v34  ;;  %v2443_v4 = vmul.f32 -1.442695, %v2113_v34 }
0x1f87   :  { %2868 = vpow2.f32 %v2443_v4 }
0x1f92   :  { %v2867_v54 = vpop.eup %2866 }
0x1f93   :  { %2123 = vrot.lane.b32.xlu1 %v2867_v54, %s2883_s0 }
0x1f94   :  { %v2869_v9 = vpop.eup %2868 }
0x1f95   :  { %v2117_v10 = vadd.f32 1.0, %v2869_v9 }
0x1f97   :  { %2870 = vrcp.f32 %v2117_v10 }
0x1fa4   :  { %v2871_v21 = vpop.eup %2870 }
0x1fa5   :  { %v2121_v13 = vmul.f32 %v2871_v21, %v1960_v26 }
0x2005   :  { %v2124_v53 = vpop.permute.xlu1 %2123 }
0x2006   :  { %v2126_v59 = vmul.f32 %v2871_v21, %v2124_v53 }
0x2008   :  { %2128 = vrot.lane.b32.xlu0 %v2126_v59, %s2886_s7 }
0x207a   :  { %v2129_v7 = vpop.permute.xlu0 %2128 }
0x207b   :  { %v2131_v14 = vadd.f32 %v2129_v7, %v2121_v13 }
0x207d   :  { %2872 = vtanh.f32 %v2131_v14 }
0x208a   :  { %v2873_v24 = vpop.eup %2872 }
0x208b   :  { %2134 = vrot.lane.b32.xlu1 %v2873_v24, %s2883_s0 }
0x20fd   :  { %v2135_v57 = vpop.permute.xlu1 %2134 }
0x20fe   :  { %v2137_v0 = vmul.f32 %v2871_v21, %v2135_v57 }
0x2100   :  { %2139 = vrot.lane.b32.xlu0 %v2137_v0, %s2886_s7 }
0x2172   :  { %v2140_v30 = vpop.permute.xlu0 %2139 }
0x2173   :  { %2692 = vmatmul.mubr.msk.f32.vlgmr.msra.gmra.mxu1 %vm1110_vm6, %v2140_v30  ;;  %2703 = vmatmul.mubr.msk.f32.vlgmr.msra.gmra.mxu0 %vm1110_vm6, %v2140_v30 }
0x2174   :  { %2706 = vmatpush3.msra.mxu1 %v3436_v29  ;;  %2713 = vmatprep.mubr.msk.f32.mxu1 %vm2884_vm5, %v2882_v1 }
0x2175   :  { %2707 = vmatprep.subr.mxu1 %v2882_v1 }
0x2176   :  { %2708 = vmatpush3.msra.mxu1 %v3441_v49 }
0x2177   :  { %2709 = vmatprep.subr.mxu1 %v2882_v1 }
0x2178   :  { %2710 = vmatpush3.msra.mxu1 %v3449_v55 }
0x2179   :  { %2711 = vmatprep.subr.mxu1 %v2882_v1 }
0x217a   :  { %2712 = vmatpush3.msra.mxu1 %v3458_v36 }
0x2233   :  { %v2209_v44 = vpop.f32.mrf.mxu1  ;;  %v2280_v48 = vpop.f32.mrf.mxu0 }
0x2234   :  { %v2210_v52 = vadd.f32 %v3516_v12, %v2209_v44  ;;  %v2284_v29 = vadd.f32 %v2280_v48, %v3428_v25 }
0x2235   :  { %v2693_v58 = vpop.f32.mrf.mxu1  ;;  %v2704_v15 = vpop.f32.mrf.mxu0 }
0x2236   :  { %2213 = vst [vmem:[%s3715_s9 + $0x30] sm:$0xff] %v2210_v52  ;;  %2874 = vtanh.f32 %v2284_v29  ;;  %v2446_v55 = vmul.f32 -1.442695, %v2284_v29 }
0x2238   :  { %2876 = vpow2.f32 %v2446_v55 }
0x2243   :  { %v2875_v49 = vpop.eup %2874 }
0x2244   :  { %2294 = vrot.lane.b32.xlu1 %v2875_v49, %s2883_s0 }
0x2245   :  { %v2877_v1 = vpop.eup %2876 }
0x2246   :  { %v2288_v36 = vadd.f32 1.0, %v2877_v1 }
0x2248   :  { %2878 = vrcp.f32 %v2288_v36 }
0x2255   :  { %v2879_v32 = vpop.eup %2878 }
0x2256   :  { %v2292_v25 = vmul.f32 %v2879_v32, %v2131_v14 }
0x22b6   :  { %v2295_v38 = vpop.permute.xlu1 %2294 }
0x22b7   :  { %v2297_v43 = vmul.f32 %v2879_v32, %v2295_v38 }
0x22b9   :  { %2299 = vrot.lane.b32.xlu0 %v2297_v43, %s2886_s7 }
0x232b   :  { %v2300_v56 = vpop.permute.xlu0 %2299 }
0x232c   :  { %v2302_v37 = vadd.f32 %v2300_v56, %v2292_v25 }
0x232e   :  { %2880 = vtanh.f32 %v2302_v37 }
0x233b   :  { %v2881_v61 = vpop.eup %2880 }
0x233c   :  { %2305 = vrot.lane.b32.xlu1 %v2881_v61, %s2883_s0 }
0x23ae   :  { %v2306_v40 = vpop.permute.xlu1 %2305 }
0x23af   :  { %v2308_v62 = vmul.f32 %v2879_v32, %v2306_v40 }
0x23b1   :  { %2310 = vrot.lane.b32.xlu0 %v2308_v62, %s2886_s7 }
0x2423   :  { %v2311_v3 = vpop.permute.xlu0 %2310 }
0x2424   :  { %2714 = vmatmul.mubr.msk.f32.vlgmr.msra.gmra.mxu1 %vm1110_vm6, %v2311_v3 }
0x24e4   :  { %v2380_v5 = vpop.f32.mrf.mxu1 }
0x24e5   :  { %v2381_v6 = vadd.f32 %v3516_v12, %v2380_v5 }
0x24e6   :  { %v2715_v8 = vpop.f32.mrf.mxu1 }
0x24e7   :  { %2384 = vst [vmem:[%s3715_s9 + $0x38] sm:$0xff] %v2381_v6 }

</bundles_post_ra>
